<compile_context>
chip_gen: v6e
topology: v6e:2x2x1
jax: 0.10.0
libtpu: 0.0.40
codegen_flags: <defaults>
</compile_context>

<pallas_src>
import math

import jax
import jax.numpy as jnp
from jax.experimental import pallas as pl
from jax.experimental.pallas import tpu as pltpu

# ---- small synthetic DistilBERT config (pretrained checkpoint is not loaded) ----
VOCAB = 50
MAX_POS = 16
HIDDEN = 32            # plays the role of BERT_EMBEDDING_SIZE
N_HEADS = 2
HEAD_DIM = HIDDEN // N_HEADS
FFN = 64
N_LAYERS = 2
NUM_LABELS = 3
LABEL_PAD = 128        # lane-dense head width; sliced back to NUM_LABELS in the wrapper
LN_EPS = 1e-12

# ---- packed small-vector table: one lane-padded [N_VEC_ROWS, 128] f32 slab ----
ROW_EMB_LN_G = 0
ROW_EMB_LN_B = 1
ROW_HEAD_B   = 2
ROW_HEAD_W   = 3                         # HIDDEN rows: classifier weight, lane-dense
ROW_LAYER0   = ROW_HEAD_W + HIDDEN
# per-layer row offsets inside the table
V_BQ, V_BK, V_BV = 0, N_HEADS, 2 * N_HEADS   # per-head biases, width HEAD_DIM
V_BO   = 3 * N_HEADS
V_LN1G = V_BO + 1
V_LN1B = V_BO + 2
V_B1   = V_BO + 3                            # width FFN
V_B2   = V_BO + 4
V_LN2G = V_BO + 5
V_LN2B = V_BO + 6
VEC_PER_LAYER = V_LN2B + 1
N_VEC_ROWS = ROW_LAYER0 + N_LAYERS * VEC_PER_LAYER


def _vmem_spec():
    return pl.BlockSpec(memory_space=pltpu.MemorySpace.VMEM)


# ---------------------------------------------------------------------------
# Single fused kernel: embedding LN -> N transformer blocks -> CLS head
# ---------------------------------------------------------------------------
def fused_dbert_kernel(emb_ref, mask_ref, wqkv_ref, wo_ref, w1_ref, w2_ref,
                       vecs_ref, out_ref):
    B, S = mask_ref.shape
    M = B * S

    def vrow(r, width=HIDDEN):
        # static slice of the packed vector table -> [1, width]
        return vecs_ref[r:r + 1, 0:width]

    def layer_norm(x, g, b):
        # single-pass LN: mean and mean(x^2) have no serial dependence
        mu = jnp.mean(x, axis=-1, keepdims=True)
        ms = jnp.mean(x * x, axis=-1, keepdims=True)
        var = ms - mu * mu
        return (x - mu) * (jax.lax.rsqrt(var + LN_EPS) * g) + b

    # ---- embedding layernorm (activations stay 2-D [B*S, H] everywhere) ----
    x = layer_norm(emb_ref[...], vrow(ROW_EMB_LN_G), vrow(ROW_EMB_LN_B))     # [M, H]

    # additive attention mask, built once and hoisted out of the layer/head loops: [B, 1, S]
    mask_add = ((mask_ref[...] - 1.0) * 1e9)[:, None, :]

    for l in range(N_LAYERS):                           # static, fully unrolled
        vbase = ROW_LAYER0 + l * VEC_PER_LAYER
        wbase = l * 3 * N_HEADS

        # per-head attention: head weights leading-axis indexed (no lane slices);
        # 1/sqrt(head_dim) is pre-folded into the Q weights at init.
        ctx_heads = []
        for h in range(N_HEADS):
            qh = (jnp.dot(x, wqkv_ref[wbase + h],
                          preferred_element_type=jnp.float32)
                  + vrow(vbase + V_BQ + h, HEAD_DIM)).reshape(B, S, HEAD_DIM)
            kh = (jnp.dot(x, wqkv_ref[wbase + N_HEADS + h],
                          preferred_element_type=jnp.float32)
                  + vrow(vbase + V_BK + h, HEAD_DIM)).reshape(B, S, HEAD_DIM)
            vh = (jnp.dot(x, wqkv_ref[wbase + 2 * N_HEADS + h],
                          preferred_element_type=jnp.float32)
                  + vrow(vbase + V_BV + h, HEAD_DIM)).reshape(B, S, HEAD_DIM)

            s = jnp.einsum('bqd,bkd->bqk', qh, kh,
                           preferred_element_type=jnp.float32)               # [B,S,S]
            s = s + mask_add
            s = s - jnp.max(s, axis=-1, keepdims=True)
            p = jnp.exp(s)
            # EUP approx reciprocal; rows are never fully masked (CLS key is always valid)
            p = p * pl.reciprocal(jnp.sum(p, axis=-1, keepdims=True), approx=True)
            ctx_heads.append(jnp.einsum('bqk,bkd->bqd', p, vh,
                                        preferred_element_type=jnp.float32))

        # merge heads (2 x 16 lanes -> 32 lanes, within one vreg) and project
        # the merged context with ONE K=H Wo matmul.
        ctx = jnp.concatenate(ctx_heads, axis=-1).reshape(M, HIDDEN)
        attn = jnp.dot(ctx, wo_ref[l],
                       preferred_element_type=jnp.float32) + vrow(vbase + V_BO)

        hdn = layer_norm(x + attn, vrow(vbase + V_LN1G), vrow(vbase + V_LN1B))

        ff = jnp.dot(hdn, w1_ref[l],
                     preferred_element_type=jnp.float32) + vrow(vbase + V_B1, FFN)
        # TODO(synk): DistilBERT uses exact (erf) GELU; tanh approximation used here.
        ff = jax.nn.gelu(ff, approximate=True)
        ff = jnp.dot(ff, w2_ref[l],
                     preferred_element_type=jnp.float32) + vrow(vbase + V_B2)

        x = layer_norm(hdn + ff, vrow(vbase + V_LN2G), vrow(vbase + V_LN2B))

    # ---- CLS token -> Linear (lane-padded to 128) -> ReLU -> Sigmoid ----
    cls = x.reshape(B, S, HIDDEN)[:, 0, :]                                   # [B, H]
    head_w = vecs_ref[ROW_HEAD_W:ROW_HEAD_W + HIDDEN, :]                     # [H, 128] lane-dense
    logits = (jnp.dot(cls, head_w, preferred_element_type=jnp.float32)
              + vrow(ROW_HEAD_B, LABEL_PAD))                                 # [B, 128]
    out_ref[...] = jax.nn.sigmoid(jnp.maximum(logits, 0.0))


# ---------------------------------------------------------------------------
# Parameters (deterministic synthetic init; frozen DistilBERT checkpoint not loaded).
# Matrix weights stacked on a leading layer/head axis; all small vectors packed
# into one lane-padded table.
# ---------------------------------------------------------------------------
def init_params(key):
    ks = iter(jax.random.split(key, 8))

    def w(shape, scale=0.02):
        return (scale * jax.random.normal(next(ks), shape)).astype(jnp.float32)

    # per-head Q/K/V projections stacked on a leading axis:
    #   row = (layer * 3 + {0:Q, 1:K, 2:V}) * N_HEADS + head
    wqkv = w((N_LAYERS * 3 * N_HEADS, HIDDEN, HEAD_DIM))
    row = jnp.arange(N_LAYERS * 3 * N_HEADS)
    is_q = ((row // N_HEADS) % 3) == 0
    # fold 1/sqrt(HEAD_DIM) into the Q weights (exact) -> no per-score multiply in the kernel
    wqkv = wqkv * jnp.where(is_q, 1.0 / math.sqrt(HEAD_DIM), 1.0)[:, None, None]

    head_w = w((HIDDEN, NUM_LABELS))

    # packed vector table: emb LN, classifier bias+weight, per-layer biases / LN params.
    # All biases and LN betas are zero in this synthetic init; LN gammas are one.
    vecs = jnp.zeros((N_VEC_ROWS, LABEL_PAD), jnp.float32)
    vecs = vecs.at[ROW_EMB_LN_G, :HIDDEN].set(1.0)
    vecs = vecs.at[ROW_HEAD_W:ROW_HEAD_W + HIDDEN, :NUM_LABELS].set(head_w)
    for l in range(N_LAYERS):
        base = ROW_LAYER0 + l * VEC_PER_LAYER
        vecs = vecs.at[base + V_LN1G, :HIDDEN].set(1.0)
        vecs = vecs.at[base + V_LN2G, :HIDDEN].set(1.0)

    return {
        'word_emb': w((VOCAB, HIDDEN)),
        'pos_emb': w((MAX_POS, HIDDEN)),
        'wqkv': wqkv,                                   # [L*3*NH, H, D], Q pre-scaled
        'wo':   w((N_LAYERS, HIDDEN, HIDDEN)),
        'w1':   w((N_LAYERS, HIDDEN, FFN)),
        'w2':   w((N_LAYERS, FFN, HIDDEN)),
        'vecs': vecs,                                   # [N_VEC_ROWS, 128]
    }


# ---------------------------------------------------------------------------
# Forward: embedding gather + reshape in the wrapper (glue), everything else in
# the single fused Pallas kernel; round + label slice back in XLA.
# ---------------------------------------------------------------------------
@jax.jit
def unimodal_dbert_forward(ids, mask, params):
    B, S = ids.shape

    emb = (params['word_emb'][ids]
           + params['pos_emb'][:S][None, :, :]).astype(jnp.float32)
    emb2 = emb.reshape(B * S, HIDDEN)                    # 2-D activations for the kernel
    mask_f = mask.astype(jnp.float32)

    sig = pl.pallas_call(
        fused_dbert_kernel,
        out_shape=jax.ShapeDtypeStruct((B, LABEL_PAD), jnp.float32),
        in_specs=[_vmem_spec()] * 7,
        out_specs=_vmem_spec(),
    )(emb2, mask_f,
      params['wqkv'], params['wo'], params['w1'], params['w2'], params['vecs'])

    x_out = sig[:, :NUM_LABELS]          # slice lane-padded output back to real label count
    pred = jnp.round(x_out)              # round-half-to-even, same as torch.round
    return x_out, pred


if __name__ == "__main__":
    B, S = 2, 8
    params = init_params(jax.random.PRNGKey(0))

    kid, _ = jax.random.split(jax.random.PRNGKey(0))
    ids = jax.random.randint(kid, (B, S), 0, VOCAB, dtype=jnp.int32)
    mask = jnp.ones((B, S), dtype=jnp.int32).at[1, 6:].set(0)   # pad tail of sample 1

    x_out, pred = unimodal_dbert_forward(ids, mask, params)
    jax.block_until_ready((x_out, pred))

    assert x_out.shape == (B, NUM_LABELS) and pred.shape == (B, NUM_LABELS)
    assert bool(jnp.all(jnp.isfinite(x_out)))
    print("KERNEL_OK")
</pallas_src>

<mosaic_0001>
module attributes {stable_mosaic.version = 11 : i64} {
  func.func @fused_dbert_kernel(%arg0: memref<16x32xf32, #tpu.memory_space<vmem>>, %arg1: memref<2x8xf32, #tpu.memory_space<vmem>>, %arg2: memref<12x32x16xf32, #tpu.memory_space<vmem>>, %arg3: memref<2x32x32xf32, #tpu.memory_space<vmem>>, %arg4: memref<2x32x64xf32, #tpu.memory_space<vmem>>, %arg5: memref<2x64x32xf32, #tpu.memory_space<vmem>>, %arg6: memref<61x128xf32, #tpu.memory_space<vmem>>, %arg7: memref<2x128xf32, #tpu.memory_space<vmem>>) attributes {dimension_semantics = [], scalar_prefetch = 0 : i64, scratch_operands = 0 : i64, tpu.core_type = #tpu.core_type<tc>} {
    %c0 = arith.constant 0 : index
    %c0_0 = arith.constant 0 : index
    %0 = vector.load %arg0[%c0, %c0_0] : memref<16x32xf32, #tpu.memory_space<vmem>>, vector<16x32xf32>
    %c0_1 = arith.constant 0 : index
    %c0_2 = arith.constant 0 : index
    %1 = vector.load %arg6[%c0_1, %c0_2] : memref<61x128xf32, #tpu.memory_space<vmem>>, vector<1x32xf32>
    %c1 = arith.constant 1 : index
    %c0_3 = arith.constant 0 : index
    %2 = vector.load %arg6[%c1, %c0_3] : memref<61x128xf32, #tpu.memory_space<vmem>>, vector<1x32xf32>
    %cst = arith.constant dense<0.000000e+00> : vector<16xf32>
    %3 = vector.multi_reduction <add>, %0, %cst [1] : vector<16x32xf32> to vector<16xf32>
    %4 = vector.shape_cast %3 : vector<16xf32> to vector<16x1xf32>
    %cst_4 = arith.constant 3.200000e+01 : f32
    %5 = vector.broadcast %cst_4 : f32 to vector<16x1xf32>
    %6 = arith.divf %4, %5 : vector<16x1xf32>
    %7 = arith.mulf %0, %0 : vector<16x32xf32>
    %cst_5 = arith.constant dense<0.000000e+00> : vector<16xf32>
    %8 = vector.multi_reduction <add>, %7, %cst_5 [1] : vector<16x32xf32> to vector<16xf32>
    %9 = vector.shape_cast %8 : vector<16xf32> to vector<16x1xf32>
    %cst_6 = arith.constant 3.200000e+01 : f32
    %10 = vector.broadcast %cst_6 : f32 to vector<16x1xf32>
    %11 = arith.divf %9, %10 : vector<16x1xf32>
    %12 = arith.mulf %6, %6 : vector<16x1xf32>
    %13 = arith.subf %11, %12 : vector<16x1xf32>
    %14 = vector.broadcast %6 : vector<16x1xf32> to vector<16x32xf32>
    %15 = arith.subf %0, %14 : vector<16x32xf32>
    %cst_7 = arith.constant 9.99999996E-13 : f32
    %16 = vector.broadcast %cst_7 : f32 to vector<16x1xf32>
    %17 = arith.addf %13, %16 : vector<16x1xf32>
    %18 = math.rsqrt %17 : vector<16x1xf32>
    %19 = vector.broadcast %18 : vector<16x1xf32> to vector<16x32xf32>
    %20 = vector.broadcast %1 : vector<1x32xf32> to vector<16x32xf32>
    %21 = arith.mulf %19, %20 : vector<16x32xf32>
    %22 = arith.mulf %15, %21 : vector<16x32xf32>
    %23 = vector.broadcast %2 : vector<1x32xf32> to vector<16x32xf32>
    %24 = arith.addf %22, %23 : vector<16x32xf32>
    %c0_8 = arith.constant 0 : index
    %c0_9 = arith.constant 0 : index
    %25 = vector.load %arg1[%c0_8, %c0_9] : memref<2x8xf32, #tpu.memory_space<vmem>>, vector<2x8xf32>
    %cst_10 = arith.constant 1.000000e+00 : f32
    %26 = vector.broadcast %cst_10 : f32 to vector<2x8xf32>
    %27 = arith.subf %25, %26 : vector<2x8xf32>
    %cst_11 = arith.constant 1.000000e+09 : f32
    %28 = vector.broadcast %cst_11 : f32 to vector<2x8xf32>
    %29 = arith.mulf %27, %28 : vector<2x8xf32>
    %30 = vector.shape_cast %29 : vector<2x8xf32> to vector<2x1x8xf32>
    %c0_12 = arith.constant 0 : index
    %c0_13 = arith.constant 0 : index
    %c0_14 = arith.constant 0 : index
    %31 = vector.load %arg2[%c0_12, %c0_13, %c0_14] : memref<12x32x16xf32, #tpu.memory_space<vmem>>, vector<1x32x16xf32>
    %32 = vector.shape_cast %31 : vector<1x32x16xf32> to vector<32x16xf32>
    %cst_15 = arith.constant dense<0.000000e+00> : vector<16x16xf32>
    %33 = tpu.matmul %24, %32, %cst_15 {dimension_numbers = #tpu.dot_dimension_numbers<[1], [0], [0], [1], [0, 0, 1, 1], [], []>} : vector<16x32xf32>, vector<32x16xf32>, vector<16x16xf32> -> vector<16x16xf32>
    %c35 = arith.constant 35 : index
    %c0_16 = arith.constant 0 : index
    %34 = vector.load %arg6[%c35, %c0_16] : memref<61x128xf32, #tpu.memory_space<vmem>>, vector<1x16xf32>
    %35 = vector.broadcast %34 : vector<1x16xf32> to vector<16x16xf32>
    %36 = arith.addf %33, %35 : vector<16x16xf32>
    %37 = vector.shape_cast %36 : vector<16x16xf32> to vector<2x8x16xf32>
    %c2 = arith.constant 2 : index
    %c0_17 = arith.constant 0 : index
    %c0_18 = arith.constant 0 : index
    %38 = vector.load %arg2[%c2, %c0_17, %c0_18] : memref<12x32x16xf32, #tpu.memory_space<vmem>>, vector<1x32x16xf32>
    %39 = vector.shape_cast %38 : vector<1x32x16xf32> to vector<32x16xf32>
    %cst_19 = arith.constant dense<0.000000e+00> : vector<16x16xf32>
    %40 = tpu.matmul %24, %39, %cst_19 {dimension_numbers = #tpu.dot_dimension_numbers<[1], [0], [0], [1], [0, 0, 1, 1], [], []>} : vector<16x32xf32>, vector<32x16xf32>, vector<16x16xf32> -> vector<16x16xf32>
    %c37 = arith.constant 37 : index
    %c0_20 = arith.constant 0 : index
    %41 = vector.load %arg6[%c37, %c0_20] : memref<61x128xf32, #tpu.memory_space<vmem>>, vector<1x16xf32>
    %42 = vector.broadcast %41 : vector<1x16xf32> to vector<16x16xf32>
    %43 = arith.addf %40, %42 : vector<16x16xf32>
    %44 = vector.shape_cast %43 : vector<16x16xf32> to vector<2x8x16xf32>
    %c4 = arith.constant 4 : index
    %c0_21 = arith.constant 0 : index
    %c0_22 = arith.constant 0 : index
    %45 = vector.load %arg2[%c4, %c0_21, %c0_22] : memref<12x32x16xf32, #tpu.memory_space<vmem>>, vector<1x32x16xf32>
    %46 = vector.shape_cast %45 : vector<1x32x16xf32> to vector<32x16xf32>
    %cst_23 = arith.constant dense<0.000000e+00> : vector<16x16xf32>
    %47 = tpu.matmul %24, %46, %cst_23 {dimension_numbers = #tpu.dot_dimension_numbers<[1], [0], [0], [1], [0, 0, 1, 1], [], []>} : vector<16x32xf32>, vector<32x16xf32>, vector<16x16xf32> -> vector<16x16xf32>
    %c39 = arith.constant 39 : index
    %c0_24 = arith.constant 0 : index
    %48 = vector.load %arg6[%c39, %c0_24] : memref<61x128xf32, #tpu.memory_space<vmem>>, vector<1x16xf32>
    %49 = vector.broadcast %48 : vector<1x16xf32> to vector<16x16xf32>
    %50 = arith.addf %47, %49 : vector<16x16xf32>
    %51 = vector.shape_cast %50 : vector<16x16xf32> to vector<2x8x16xf32>
    "tpu.trace_start"() <{level = 10 : i32, message = "bqd,bkd->bqk"}> : () -> ()
    %cst_25 = arith.constant dense<0.000000e+00> : vector<2x8x8xf32>
    %52 = tpu.matmul %37, %44, %cst_25 {dimension_numbers = #tpu.dot_dimension_numbers<[2], [2], [1], [1], [0, 0, 0, 1, 1, 1], [0], [0]>} : vector<2x8x16xf32>, vector<2x8x16xf32>, vector<2x8x8xf32> -> vector<2x8x8xf32>
    "tpu.trace_stop"() : () -> ()
    %53 = vector.broadcast %30 : vector<2x1x8xf32> to vector<2x8x8xf32>
    %54 = arith.addf %52, %53 : vector<2x8x8xf32>
    %cst_26 = arith.constant dense<0xFF800000> : vector<2x8xf32>
    %55 = vector.multi_reduction <maximumf>, %54, %cst_26 [2] : vector<2x8x8xf32> to vector<2x8xf32>
    %56 = vector.shape_cast %55 : vector<2x8xf32> to vector<2x8x1xf32>
    %57 = vector.broadcast %56 : vector<2x8x1xf32> to vector<2x8x8xf32>
    %58 = arith.subf %54, %57 : vector<2x8x8xf32>
    %59 = math.exp %58 : vector<2x8x8xf32>
    %cst_27 = arith.constant dense<0.000000e+00> : vector<2x8xf32>
    %60 = vector.multi_reduction <add>, %59, %cst_27 [2] : vector<2x8x8xf32> to vector<2x8xf32>
    %61 = vector.shape_cast %60 : vector<2x8xf32> to vector<2x8x1xf32>
    %62 = tpu.reciprocal %61 {approx = true} : vector<2x8x1xf32> -> vector<2x8x1xf32>
    %63 = vector.broadcast %62 : vector<2x8x1xf32> to vector<2x8x8xf32>
    %64 = arith.mulf %59, %63 : vector<2x8x8xf32>
    "tpu.trace_start"() <{level = 10 : i32, message = "bqk,bkd->bqd"}> : () -> ()
    %cst_28 = arith.constant dense<0.000000e+00> : vector<2x8x16xf32>
    %65 = tpu.matmul %64, %51, %cst_28 {dimension_numbers = #tpu.dot_dimension_numbers<[2], [1], [1], [2], [0, 0, 0, 1, 1, 2], [0], [0]>} : vector<2x8x8xf32>, vector<2x8x16xf32>, vector<2x8x16xf32> -> vector<2x8x16xf32>
    "tpu.trace_stop"() : () -> ()
    %c1_29 = arith.constant 1 : index
    %c0_30 = arith.constant 0 : index
    %c0_31 = arith.constant 0 : index
    %66 = vector.load %arg2[%c1_29, %c0_30, %c0_31] : memref<12x32x16xf32, #tpu.memory_space<vmem>>, vector<1x32x16xf32>
    %67 = vector.shape_cast %66 : vector<1x32x16xf32> to vector<32x16xf32>
    %cst_32 = arith.constant dense<0.000000e+00> : vector<16x16xf32>
    %68 = tpu.matmul %24, %67, %cst_32 {dimension_numbers = #tpu.dot_dimension_numbers<[1], [0], [0], [1], [0, 0, 1, 1], [], []>} : vector<16x32xf32>, vector<32x16xf32>, vector<16x16xf32> -> vector<16x16xf32>
    %c36 = arith.constant 36 : index
    %c0_33 = arith.constant 0 : index
    %69 = vector.load %arg6[%c36, %c0_33] : memref<61x128xf32, #tpu.memory_space<vmem>>, vector<1x16xf32>
    %70 = vector.broadcast %69 : vector<1x16xf32> to vector<16x16xf32>
    %71 = arith.addf %68, %70 : vector<16x16xf32>
    %72 = vector.shape_cast %71 : vector<16x16xf32> to vector<2x8x16xf32>
    %c3 = arith.constant 3 : index
    %c0_34 = arith.constant 0 : index
    %c0_35 = arith.constant 0 : index
    %73 = vector.load %arg2[%c3, %c0_34, %c0_35] : memref<12x32x16xf32, #tpu.memory_space<vmem>>, vector<1x32x16xf32>
    %74 = vector.shape_cast %73 : vector<1x32x16xf32> to vector<32x16xf32>
    %cst_36 = arith.constant dense<0.000000e+00> : vector<16x16xf32>
    %75 = tpu.matmul %24, %74, %cst_36 {dimension_numbers = #tpu.dot_dimension_numbers<[1], [0], [0], [1], [0, 0, 1, 1], [], []>} : vector<16x32xf32>, vector<32x16xf32>, vector<16x16xf32> -> vector<16x16xf32>
    %c38 = arith.constant 38 : index
    %c0_37 = arith.constant 0 : index
    %76 = vector.load %arg6[%c38, %c0_37] : memref<61x128xf32, #tpu.memory_space<vmem>>, vector<1x16xf32>
    %77 = vector.broadcast %76 : vector<1x16xf32> to vector<16x16xf32>
    %78 = arith.addf %75, %77 : vector<16x16xf32>
    %79 = vector.shape_cast %78 : vector<16x16xf32> to vector<2x8x16xf32>
    %c5 = arith.constant 5 : index
    %c0_38 = arith.constant 0 : index
    %c0_39 = arith.constant 0 : index
    %80 = vector.load %arg2[%c5, %c0_38, %c0_39] : memref<12x32x16xf32, #tpu.memory_space<vmem>>, vector<1x32x16xf32>
    %81 = vector.shape_cast %80 : vector<1x32x16xf32> to vector<32x16xf32>
    %cst_40 = arith.constant dense<0.000000e+00> : vector<16x16xf32>
    %82 = tpu.matmul %24, %81, %cst_40 {dimension_numbers = #tpu.dot_dimension_numbers<[1], [0], [0], [1], [0, 0, 1, 1], [], []>} : vector<16x32xf32>, vector<32x16xf32>, vector<16x16xf32> -> vector<16x16xf32>
    %c40 = arith.constant 40 : index
    %c0_41 = arith.constant 0 : index
    %83 = vector.load %arg6[%c40, %c0_41] : memref<61x128xf32, #tpu.memory_space<vmem>>, vector<1x16xf32>
    %84 = vector.broadcast %83 : vector<1x16xf32> to vector<16x16xf32>
    %85 = arith.addf %82, %84 : vector<16x16xf32>
    %86 = vector.shape_cast %85 : vector<16x16xf32> to vector<2x8x16xf32>
    "tpu.trace_start"() <{level = 10 : i32, message = "bqd,bkd->bqk"}> : () -> ()
    %cst_42 = arith.constant dense<0.000000e+00> : vector<2x8x8xf32>
    %87 = tpu.matmul %72, %79, %cst_42 {dimension_numbers = #tpu.dot_dimension_numbers<[2], [2], [1], [1], [0, 0, 0, 1, 1, 1], [0], [0]>} : vector<2x8x16xf32>, vector<2x8x16xf32>, vector<2x8x8xf32> -> vector<2x8x8xf32>
    "tpu.trace_stop"() : () -> ()
    %88 = vector.broadcast %30 : vector<2x1x8xf32> to vector<2x8x8xf32>
    %89 = arith.addf %87, %88 : vector<2x8x8xf32>
    %cst_43 = arith.constant dense<0xFF800000> : vector<2x8xf32>
    %90 = vector.multi_reduction <maximumf>, %89, %cst_43 [2] : vector<2x8x8xf32> to vector<2x8xf32>
    %91 = vector.shape_cast %90 : vector<2x8xf32> to vector<2x8x1xf32>
    %92 = vector.broadcast %91 : vector<2x8x1xf32> to vector<2x8x8xf32>
    %93 = arith.subf %89, %92 : vector<2x8x8xf32>
    %94 = math.exp %93 : vector<2x8x8xf32>
    %cst_44 = arith.constant dense<0.000000e+00> : vector<2x8xf32>
    %95 = vector.multi_reduction <add>, %94, %cst_44 [2] : vector<2x8x8xf32> to vector<2x8xf32>
    %96 = vector.shape_cast %95 : vector<2x8xf32> to vector<2x8x1xf32>
    %97 = tpu.reciprocal %96 {approx = true} : vector<2x8x1xf32> -> vector<2x8x1xf32>
    %98 = vector.broadcast %97 : vector<2x8x1xf32> to vector<2x8x8xf32>
    %99 = arith.mulf %94, %98 : vector<2x8x8xf32>
    "tpu.trace_start"() <{level = 10 : i32, message = "bqk,bkd->bqd"}> : () -> ()
    %cst_45 = arith.constant dense<0.000000e+00> : vector<2x8x16xf32>
    %100 = tpu.matmul %99, %86, %cst_45 {dimension_numbers = #tpu.dot_dimension_numbers<[2], [1], [1], [2], [0, 0, 0, 1, 1, 2], [0], [0]>} : vector<2x8x8xf32>, vector<2x8x16xf32>, vector<2x8x16xf32> -> vector<2x8x16xf32>
    "tpu.trace_stop"() : () -> ()
    %101 = tpu.concatenate %65, %100 in 2 : vector<2x8x16xf32>, vector<2x8x16xf32> -> vector<2x8x32xf32>
    %102 = vector.shape_cast %101 : vector<2x8x32xf32> to vector<16x32xf32>
    %c0_46 = arith.constant 0 : index
    %c0_47 = arith.constant 0 : index
    %c0_48 = arith.constant 0 : index
    %103 = vector.load %arg3[%c0_46, %c0_47, %c0_48] : memref<2x32x32xf32, #tpu.memory_space<vmem>>, vector<1x32x32xf32>
    %104 = vector.shape_cast %103 : vector<1x32x32xf32> to vector<32x32xf32>
    %cst_49 = arith.constant dense<0.000000e+00> : vector<16x32xf32>
    %105 = tpu.matmul %102, %104, %cst_49 {dimension_numbers = #tpu.dot_dimension_numbers<[1], [0], [0], [1], [0, 0, 1, 1], [], []>} : vector<16x32xf32>, vector<32x32xf32>, vector<16x32xf32> -> vector<16x32xf32>
    %c41 = arith.constant 41 : index
    %c0_50 = arith.constant 0 : index
    %106 = vector.load %arg6[%c41, %c0_50] : memref<61x128xf32, #tpu.memory_space<vmem>>, vector<1x32xf32>
    %107 = vector.broadcast %106 : vector<1x32xf32> to vector<16x32xf32>
    %108 = arith.addf %105, %107 : vector<16x32xf32>
    %109 = arith.addf %24, %108 : vector<16x32xf32>
    %c42 = arith.constant 42 : index
    %c0_51 = arith.constant 0 : index
    %110 = vector.load %arg6[%c42, %c0_51] : memref<61x128xf32, #tpu.memory_space<vmem>>, vector<1x32xf32>
    %c43 = arith.constant 43 : index
    %c0_52 = arith.constant 0 : index
    %111 = vector.load %arg6[%c43, %c0_52] : memref<61x128xf32, #tpu.memory_space<vmem>>, vector<1x32xf32>
    %cst_53 = arith.constant dense<0.000000e+00> : vector<16xf32>
    %112 = vector.multi_reduction <add>, %109, %cst_53 [1] : vector<16x32xf32> to vector<16xf32>
    %113 = vector.shape_cast %112 : vector<16xf32> to vector<16x1xf32>
    %cst_54 = arith.constant 3.200000e+01 : f32
    %114 = vector.broadcast %cst_54 : f32 to vector<16x1xf32>
    %115 = arith.divf %113, %114 : vector<16x1xf32>
    %116 = arith.mulf %109, %109 : vector<16x32xf32>
    %cst_55 = arith.constant dense<0.000000e+00> : vector<16xf32>
    %117 = vector.multi_reduction <add>, %116, %cst_55 [1] : vector<16x32xf32> to vector<16xf32>
    %118 = vector.shape_cast %117 : vector<16xf32> to vector<16x1xf32>
    %cst_56 = arith.constant 3.200000e+01 : f32
    %119 = vector.broadcast %cst_56 : f32 to vector<16x1xf32>
    %120 = arith.divf %118, %119 : vector<16x1xf32>
    %121 = arith.mulf %115, %115 : vector<16x1xf32>
    %122 = arith.subf %120, %121 : vector<16x1xf32>
    %123 = vector.broadcast %115 : vector<16x1xf32> to vector<16x32xf32>
    %124 = arith.subf %109, %123 : vector<16x32xf32>
    %cst_57 = arith.constant 9.99999996E-13 : f32
    %125 = vector.broadcast %cst_57 : f32 to vector<16x1xf32>
    %126 = arith.addf %122, %125 : vector<16x1xf32>
    %127 = math.rsqrt %126 : vector<16x1xf32>
    %128 = vector.broadcast %127 : vector<16x1xf32> to vector<16x32xf32>
    %129 = vector.broadcast %110 : vector<1x32xf32> to vector<16x32xf32>
    %130 = arith.mulf %128, %129 : vector<16x32xf32>
    %131 = arith.mulf %124, %130 : vector<16x32xf32>
    %132 = vector.broadcast %111 : vector<1x32xf32> to vector<16x32xf32>
    %133 = arith.addf %131, %132 : vector<16x32xf32>
    %c0_58 = arith.constant 0 : index
    %c0_59 = arith.constant 0 : index
    %c0_60 = arith.constant 0 : index
    %134 = vector.load %arg4[%c0_58, %c0_59, %c0_60] : memref<2x32x64xf32, #tpu.memory_space<vmem>>, vector<1x32x64xf32>
    %135 = vector.shape_cast %134 : vector<1x32x64xf32> to vector<32x64xf32>
    %cst_61 = arith.constant dense<0.000000e+00> : vector<16x64xf32>
    %136 = tpu.matmul %133, %135, %cst_61 {dimension_numbers = #tpu.dot_dimension_numbers<[1], [0], [0], [1], [0, 0, 1, 1], [], []>} : vector<16x32xf32>, vector<32x64xf32>, vector<16x64xf32> -> vector<16x64xf32>
    %c44 = arith.constant 44 : index
    %c0_62 = arith.constant 0 : index
    %137 = vector.load %arg6[%c44, %c0_62] : memref<61x128xf32, #tpu.memory_space<vmem>>, vector<1x64xf32>
    %138 = vector.broadcast %137 : vector<1x64xf32> to vector<16x64xf32>
    %139 = arith.addf %136, %138 : vector<16x64xf32>
    %140 = arith.mulf %139, %139 : vector<16x64xf32>
    %141 = arith.mulf %139, %140 : vector<16x64xf32>
    %cst_63 = arith.constant 4.471500e-02 : f32
    %142 = vector.broadcast %cst_63 : f32 to vector<16x64xf32>
    %143 = arith.mulf %142, %141 : vector<16x64xf32>
    %144 = arith.addf %139, %143 : vector<16x64xf32>
    %cst_64 = arith.constant 0.797884583 : f32
    %145 = vector.broadcast %cst_64 : f32 to vector<16x64xf32>
    %146 = arith.mulf %145, %144 : vector<16x64xf32>
    %147 = math.tanh %146 : vector<16x64xf32>
    %cst_65 = arith.constant 1.000000e+00 : f32
    %148 = vector.broadcast %cst_65 : f32 to vector<16x64xf32>
    %149 = arith.addf %148, %147 : vector<16x64xf32>
    %cst_66 = arith.constant 5.000000e-01 : f32
    %150 = vector.broadcast %cst_66 : f32 to vector<16x64xf32>
    %151 = arith.mulf %150, %149 : vector<16x64xf32>
    %152 = arith.mulf %139, %151 : vector<16x64xf32>
    %c0_67 = arith.constant 0 : index
    %c0_68 = arith.constant 0 : index
    %c0_69 = arith.constant 0 : index
    %153 = vector.load %arg5[%c0_67, %c0_68, %c0_69] : memref<2x64x32xf32, #tpu.memory_space<vmem>>, vector<1x64x32xf32>
    %154 = vector.shape_cast %153 : vector<1x64x32xf32> to vector<64x32xf32>
    %cst_70 = arith.constant dense<0.000000e+00> : vector<16x32xf32>
    %155 = tpu.matmul %152, %154, %cst_70 {dimension_numbers = #tpu.dot_dimension_numbers<[1], [0], [0], [1], [0, 0, 1, 1], [], []>} : vector<16x64xf32>, vector<64x32xf32>, vector<16x32xf32> -> vector<16x32xf32>
    %c45 = arith.constant 45 : index
    %c0_71 = arith.constant 0 : index
    %156 = vector.load %arg6[%c45, %c0_71] : memref<61x128xf32, #tpu.memory_space<vmem>>, vector<1x32xf32>
    %157 = vector.broadcast %156 : vector<1x32xf32> to vector<16x32xf32>
    %158 = arith.addf %155, %157 : vector<16x32xf32>
    %159 = arith.addf %133, %158 : vector<16x32xf32>
    %c46 = arith.constant 46 : index
    %c0_72 = arith.constant 0 : index
    %160 = vector.load %arg6[%c46, %c0_72] : memref<61x128xf32, #tpu.memory_space<vmem>>, vector<1x32xf32>
    %c47 = arith.constant 47 : index
    %c0_73 = arith.constant 0 : index
    %161 = vector.load %arg6[%c47, %c0_73] : memref<61x128xf32, #tpu.memory_space<vmem>>, vector<1x32xf32>
    %cst_74 = arith.constant dense<0.000000e+00> : vector<16xf32>
    %162 = vector.multi_reduction <add>, %159, %cst_74 [1] : vector<16x32xf32> to vector<16xf32>
    %163 = vector.shape_cast %162 : vector<16xf32> to vector<16x1xf32>
    %cst_75 = arith.constant 3.200000e+01 : f32
    %164 = vector.broadcast %cst_75 : f32 to vector<16x1xf32>
    %165 = arith.divf %163, %164 : vector<16x1xf32>
    %166 = arith.mulf %159, %159 : vector<16x32xf32>
    %cst_76 = arith.constant dense<0.000000e+00> : vector<16xf32>
    %167 = vector.multi_reduction <add>, %166, %cst_76 [1] : vector<16x32xf32> to vector<16xf32>
    %168 = vector.shape_cast %167 : vector<16xf32> to vector<16x1xf32>
    %cst_77 = arith.constant 3.200000e+01 : f32
    %169 = vector.broadcast %cst_77 : f32 to vector<16x1xf32>
    %170 = arith.divf %168, %169 : vector<16x1xf32>
    %171 = arith.mulf %165, %165 : vector<16x1xf32>
    %172 = arith.subf %170, %171 : vector<16x1xf32>
    %173 = vector.broadcast %165 : vector<16x1xf32> to vector<16x32xf32>
    %174 = arith.subf %159, %173 : vector<16x32xf32>
    %cst_78 = arith.constant 9.99999996E-13 : f32
    %175 = vector.broadcast %cst_78 : f32 to vector<16x1xf32>
    %176 = arith.addf %172, %175 : vector<16x1xf32>
    %177 = math.rsqrt %176 : vector<16x1xf32>
    %178 = vector.broadcast %177 : vector<16x1xf32> to vector<16x32xf32>
    %179 = vector.broadcast %160 : vector<1x32xf32> to vector<16x32xf32>
    %180 = arith.mulf %178, %179 : vector<16x32xf32>
    %181 = arith.mulf %174, %180 : vector<16x32xf32>
    %182 = vector.broadcast %161 : vector<1x32xf32> to vector<16x32xf32>
    %183 = arith.addf %181, %182 : vector<16x32xf32>
    %c6 = arith.constant 6 : index
    %c0_79 = arith.constant 0 : index
    %c0_80 = arith.constant 0 : index
    %184 = vector.load %arg2[%c6, %c0_79, %c0_80] : memref<12x32x16xf32, #tpu.memory_space<vmem>>, vector<1x32x16xf32>
    %185 = vector.shape_cast %184 : vector<1x32x16xf32> to vector<32x16xf32>
    %cst_81 = arith.constant dense<0.000000e+00> : vector<16x16xf32>
    %186 = tpu.matmul %183, %185, %cst_81 {dimension_numbers = #tpu.dot_dimension_numbers<[1], [0], [0], [1], [0, 0, 1, 1], [], []>} : vector<16x32xf32>, vector<32x16xf32>, vector<16x16xf32> -> vector<16x16xf32>
    %c48 = arith.constant 48 : index
    %c0_82 = arith.constant 0 : index
    %187 = vector.load %arg6[%c48, %c0_82] : memref<61x128xf32, #tpu.memory_space<vmem>>, vector<1x16xf32>
    %188 = vector.broadcast %187 : vector<1x16xf32> to vector<16x16xf32>
    %189 = arith.addf %186, %188 : vector<16x16xf32>
    %190 = vector.shape_cast %189 : vector<16x16xf32> to vector<2x8x16xf32>
    %c8 = arith.constant 8 : index
    %c0_83 = arith.constant 0 : index
    %c0_84 = arith.constant 0 : index
    %191 = vector.load %arg2[%c8, %c0_83, %c0_84] : memref<12x32x16xf32, #tpu.memory_space<vmem>>, vector<1x32x16xf32>
    %192 = vector.shape_cast %191 : vector<1x32x16xf32> to vector<32x16xf32>
    %cst_85 = arith.constant dense<0.000000e+00> : vector<16x16xf32>
    %193 = tpu.matmul %183, %192, %cst_85 {dimension_numbers = #tpu.dot_dimension_numbers<[1], [0], [0], [1], [0, 0, 1, 1], [], []>} : vector<16x32xf32>, vector<32x16xf32>, vector<16x16xf32> -> vector<16x16xf32>
    %c50 = arith.constant 50 : index
    %c0_86 = arith.constant 0 : index
    %194 = vector.load %arg6[%c50, %c0_86] : memref<61x128xf32, #tpu.memory_space<vmem>>, vector<1x16xf32>
    %195 = vector.broadcast %194 : vector<1x16xf32> to vector<16x16xf32>
    %196 = arith.addf %193, %195 : vector<16x16xf32>
    %197 = vector.shape_cast %196 : vector<16x16xf32> to vector<2x8x16xf32>
    %c10 = arith.constant 10 : index
    %c0_87 = arith.constant 0 : index
    %c0_88 = arith.constant 0 : index
    %198 = vector.load %arg2[%c10, %c0_87, %c0_88] : memref<12x32x16xf32, #tpu.memory_space<vmem>>, vector<1x32x16xf32>
    %199 = vector.shape_cast %198 : vector<1x32x16xf32> to vector<32x16xf32>
    %cst_89 = arith.constant dense<0.000000e+00> : vector<16x16xf32>
    %200 = tpu.matmul %183, %199, %cst_89 {dimension_numbers = #tpu.dot_dimension_numbers<[1], [0], [0], [1], [0, 0, 1, 1], [], []>} : vector<16x32xf32>, vector<32x16xf32>, vector<16x16xf32> -> vector<16x16xf32>
    %c52 = arith.constant 52 : index
    %c0_90 = arith.constant 0 : index
    %201 = vector.load %arg6[%c52, %c0_90] : memref<61x128xf32, #tpu.memory_space<vmem>>, vector<1x16xf32>
    %202 = vector.broadcast %201 : vector<1x16xf32> to vector<16x16xf32>
    %203 = arith.addf %200, %202 : vector<16x16xf32>
    %204 = vector.shape_cast %203 : vector<16x16xf32> to vector<2x8x16xf32>
    "tpu.trace_start"() <{level = 10 : i32, message = "bqd,bkd->bqk"}> : () -> ()
    %cst_91 = arith.constant dense<0.000000e+00> : vector<2x8x8xf32>
    %205 = tpu.matmul %190, %197, %cst_91 {dimension_numbers = #tpu.dot_dimension_numbers<[2], [2], [1], [1], [0, 0, 0, 1, 1, 1], [0], [0]>} : vector<2x8x16xf32>, vector<2x8x16xf32>, vector<2x8x8xf32> -> vector<2x8x8xf32>
    "tpu.trace_stop"() : () -> ()
    %206 = vector.broadcast %30 : vector<2x1x8xf32> to vector<2x8x8xf32>
    %207 = arith.addf %205, %206 : vector<2x8x8xf32>
    %cst_92 = arith.constant dense<0xFF800000> : vector<2x8xf32>
    %208 = vector.multi_reduction <maximumf>, %207, %cst_92 [2] : vector<2x8x8xf32> to vector<2x8xf32>
    %209 = vector.shape_cast %208 : vector<2x8xf32> to vector<2x8x1xf32>
    %210 = vector.broadcast %209 : vector<2x8x1xf32> to vector<2x8x8xf32>
    %211 = arith.subf %207, %210 : vector<2x8x8xf32>
    %212 = math.exp %211 : vector<2x8x8xf32>
    %cst_93 = arith.constant dense<0.000000e+00> : vector<2x8xf32>
    %213 = vector.multi_reduction <add>, %212, %cst_93 [2] : vector<2x8x8xf32> to vector<2x8xf32>
    %214 = vector.shape_cast %213 : vector<2x8xf32> to vector<2x8x1xf32>
    %215 = tpu.reciprocal %214 {approx = true} : vector<2x8x1xf32> -> vector<2x8x1xf32>
    %216 = vector.broadcast %215 : vector<2x8x1xf32> to vector<2x8x8xf32>
    %217 = arith.mulf %212, %216 : vector<2x8x8xf32>
    "tpu.trace_start"() <{level = 10 : i32, message = "bqk,bkd->bqd"}> : () -> ()
    %cst_94 = arith.constant dense<0.000000e+00> : vector<2x8x16xf32>
    %218 = tpu.matmul %217, %204, %cst_94 {dimension_numbers = #tpu.dot_dimension_numbers<[2], [1], [1], [2], [0, 0, 0, 1, 1, 2], [0], [0]>} : vector<2x8x8xf32>, vector<2x8x16xf32>, vector<2x8x16xf32> -> vector<2x8x16xf32>
    "tpu.trace_stop"() : () -> ()
    %c7 = arith.constant 7 : index
    %c0_95 = arith.constant 0 : index
    %c0_96 = arith.constant 0 : index
    %219 = vector.load %arg2[%c7, %c0_95, %c0_96] : memref<12x32x16xf32, #tpu.memory_space<vmem>>, vector<1x32x16xf32>
    %220 = vector.shape_cast %219 : vector<1x32x16xf32> to vector<32x16xf32>
    %cst_97 = arith.constant dense<0.000000e+00> : vector<16x16xf32>
    %221 = tpu.matmul %183, %220, %cst_97 {dimension_numbers = #tpu.dot_dimension_numbers<[1], [0], [0], [1], [0, 0, 1, 1], [], []>} : vector<16x32xf32>, vector<32x16xf32>, vector<16x16xf32> -> vector<16x16xf32>
    %c49 = arith.constant 49 : index
    %c0_98 = arith.constant 0 : index
    %222 = vector.load %arg6[%c49, %c0_98] : memref<61x128xf32, #tpu.memory_space<vmem>>, vector<1x16xf32>
    %223 = vector.broadcast %222 : vector<1x16xf32> to vector<16x16xf32>
    %224 = arith.addf %221, %223 : vector<16x16xf32>
    %225 = vector.shape_cast %224 : vector<16x16xf32> to vector<2x8x16xf32>
    %c9 = arith.constant 9 : index
    %c0_99 = arith.constant 0 : index
    %c0_100 = arith.constant 0 : index
    %226 = vector.load %arg2[%c9, %c0_99, %c0_100] : memref<12x32x16xf32, #tpu.memory_space<vmem>>, vector<1x32x16xf32>
    %227 = vector.shape_cast %226 : vector<1x32x16xf32> to vector<32x16xf32>
    %cst_101 = arith.constant dense<0.000000e+00> : vector<16x16xf32>
    %228 = tpu.matmul %183, %227, %cst_101 {dimension_numbers = #tpu.dot_dimension_numbers<[1], [0], [0], [1], [0, 0, 1, 1], [], []>} : vector<16x32xf32>, vector<32x16xf32>, vector<16x16xf32> -> vector<16x16xf32>
    %c51 = arith.constant 51 : index
    %c0_102 = arith.constant 0 : index
    %229 = vector.load %arg6[%c51, %c0_102] : memref<61x128xf32, #tpu.memory_space<vmem>>, vector<1x16xf32>
    %230 = vector.broadcast %229 : vector<1x16xf32> to vector<16x16xf32>
    %231 = arith.addf %228, %230 : vector<16x16xf32>
    %232 = vector.shape_cast %231 : vector<16x16xf32> to vector<2x8x16xf32>
    %c11 = arith.constant 11 : index
    %c0_103 = arith.constant 0 : index
    %c0_104 = arith.constant 0 : index
    %233 = vector.load %arg2[%c11, %c0_103, %c0_104] : memref<12x32x16xf32, #tpu.memory_space<vmem>>, vector<1x32x16xf32>
    %234 = vector.shape_cast %233 : vector<1x32x16xf32> to vector<32x16xf32>
    %cst_105 = arith.constant dense<0.000000e+00> : vector<16x16xf32>
    %235 = tpu.matmul %183, %234, %cst_105 {dimension_numbers = #tpu.dot_dimension_numbers<[1], [0], [0], [1], [0, 0, 1, 1], [], []>} : vector<16x32xf32>, vector<32x16xf32>, vector<16x16xf32> -> vector<16x16xf32>
    %c53 = arith.constant 53 : index
    %c0_106 = arith.constant 0 : index
    %236 = vector.load %arg6[%c53, %c0_106] : memref<61x128xf32, #tpu.memory_space<vmem>>, vector<1x16xf32>
    %237 = vector.broadcast %236 : vector<1x16xf32> to vector<16x16xf32>
    %238 = arith.addf %235, %237 : vector<16x16xf32>
    %239 = vector.shape_cast %238 : vector<16x16xf32> to vector<2x8x16xf32>
    "tpu.trace_start"() <{level = 10 : i32, message = "bqd,bkd->bqk"}> : () -> ()
    %cst_107 = arith.constant dense<0.000000e+00> : vector<2x8x8xf32>
    %240 = tpu.matmul %225, %232, %cst_107 {dimension_numbers = #tpu.dot_dimension_numbers<[2], [2], [1], [1], [0, 0, 0, 1, 1, 1], [0], [0]>} : vector<2x8x16xf32>, vector<2x8x16xf32>, vector<2x8x8xf32> -> vector<2x8x8xf32>
    "tpu.trace_stop"() : () -> ()
    %241 = vector.broadcast %30 : vector<2x1x8xf32> to vector<2x8x8xf32>
    %242 = arith.addf %240, %241 : vector<2x8x8xf32>
    %cst_108 = arith.constant dense<0xFF800000> : vector<2x8xf32>
    %243 = vector.multi_reduction <maximumf>, %242, %cst_108 [2] : vector<2x8x8xf32> to vector<2x8xf32>
    %244 = vector.shape_cast %243 : vector<2x8xf32> to vector<2x8x1xf32>
    %245 = vector.broadcast %244 : vector<2x8x1xf32> to vector<2x8x8xf32>
    %246 = arith.subf %242, %245 : vector<2x8x8xf32>
    %247 = math.exp %246 : vector<2x8x8xf32>
    %cst_109 = arith.constant dense<0.000000e+00> : vector<2x8xf32>
    %248 = vector.multi_reduction <add>, %247, %cst_109 [2] : vector<2x8x8xf32> to vector<2x8xf32>
    %249 = vector.shape_cast %248 : vector<2x8xf32> to vector<2x8x1xf32>
    %250 = tpu.reciprocal %249 {approx = true} : vector<2x8x1xf32> -> vector<2x8x1xf32>
    %251 = vector.broadcast %250 : vector<2x8x1xf32> to vector<2x8x8xf32>
    %252 = arith.mulf %247, %251 : vector<2x8x8xf32>
    "tpu.trace_start"() <{level = 10 : i32, message = "bqk,bkd->bqd"}> : () -> ()
    %cst_110 = arith.constant dense<0.000000e+00> : vector<2x8x16xf32>
    %253 = tpu.matmul %252, %239, %cst_110 {dimension_numbers = #tpu.dot_dimension_numbers<[2], [1], [1], [2], [0, 0, 0, 1, 1, 2], [0], [0]>} : vector<2x8x8xf32>, vector<2x8x16xf32>, vector<2x8x16xf32> -> vector<2x8x16xf32>
    "tpu.trace_stop"() : () -> ()
    %254 = tpu.concatenate %218, %253 in 2 : vector<2x8x16xf32>, vector<2x8x16xf32> -> vector<2x8x32xf32>
    %255 = vector.shape_cast %254 : vector<2x8x32xf32> to vector<16x32xf32>
    %c1_111 = arith.constant 1 : index
    %c0_112 = arith.constant 0 : index
    %c0_113 = arith.constant 0 : index
    %256 = vector.load %arg3[%c1_111, %c0_112, %c0_113] : memref<2x32x32xf32, #tpu.memory_space<vmem>>, vector<1x32x32xf32>
    %257 = vector.shape_cast %256 : vector<1x32x32xf32> to vector<32x32xf32>
    %cst_114 = arith.constant dense<0.000000e+00> : vector<16x32xf32>
    %258 = tpu.matmul %255, %257, %cst_114 {dimension_numbers = #tpu.dot_dimension_numbers<[1], [0], [0], [1], [0, 0, 1, 1], [], []>} : vector<16x32xf32>, vector<32x32xf32>, vector<16x32xf32> -> vector<16x32xf32>
    %c54 = arith.constant 54 : index
    %c0_115 = arith.constant 0 : index
    %259 = vector.load %arg6[%c54, %c0_115] : memref<61x128xf32, #tpu.memory_space<vmem>>, vector<1x32xf32>
    %260 = vector.broadcast %259 : vector<1x32xf32> to vector<16x32xf32>
    %261 = arith.addf %258, %260 : vector<16x32xf32>
    %262 = arith.addf %183, %261 : vector<16x32xf32>
    %c55 = arith.constant 55 : index
    %c0_116 = arith.constant 0 : index
    %263 = vector.load %arg6[%c55, %c0_116] : memref<61x128xf32, #tpu.memory_space<vmem>>, vector<1x32xf32>
    %c56 = arith.constant 56 : index
    %c0_117 = arith.constant 0 : index
    %264 = vector.load %arg6[%c56, %c0_117] : memref<61x128xf32, #tpu.memory_space<vmem>>, vector<1x32xf32>
    %cst_118 = arith.constant dense<0.000000e+00> : vector<16xf32>
    %265 = vector.multi_reduction <add>, %262, %cst_118 [1] : vector<16x32xf32> to vector<16xf32>
    %266 = vector.shape_cast %265 : vector<16xf32> to vector<16x1xf32>
    %cst_119 = arith.constant 3.200000e+01 : f32
    %267 = vector.broadcast %cst_119 : f32 to vector<16x1xf32>
    %268 = arith.divf %266, %267 : vector<16x1xf32>
    %269 = arith.mulf %262, %262 : vector<16x32xf32>
    %cst_120 = arith.constant dense<0.000000e+00> : vector<16xf32>
    %270 = vector.multi_reduction <add>, %269, %cst_120 [1] : vector<16x32xf32> to vector<16xf32>
    %271 = vector.shape_cast %270 : vector<16xf32> to vector<16x1xf32>
    %cst_121 = arith.constant 3.200000e+01 : f32
    %272 = vector.broadcast %cst_121 : f32 to vector<16x1xf32>
    %273 = arith.divf %271, %272 : vector<16x1xf32>
    %274 = arith.mulf %268, %268 : vector<16x1xf32>
    %275 = arith.subf %273, %274 : vector<16x1xf32>
    %276 = vector.broadcast %268 : vector<16x1xf32> to vector<16x32xf32>
    %277 = arith.subf %262, %276 : vector<16x32xf32>
    %cst_122 = arith.constant 9.99999996E-13 : f32
    %278 = vector.broadcast %cst_122 : f32 to vector<16x1xf32>
    %279 = arith.addf %275, %278 : vector<16x1xf32>
    %280 = math.rsqrt %279 : vector<16x1xf32>
    %281 = vector.broadcast %280 : vector<16x1xf32> to vector<16x32xf32>
    %282 = vector.broadcast %263 : vector<1x32xf32> to vector<16x32xf32>
    %283 = arith.mulf %281, %282 : vector<16x32xf32>
    %284 = arith.mulf %277, %283 : vector<16x32xf32>
    %285 = vector.broadcast %264 : vector<1x32xf32> to vector<16x32xf32>
    %286 = arith.addf %284, %285 : vector<16x32xf32>
    %c1_123 = arith.constant 1 : index
    %c0_124 = arith.constant 0 : index
    %c0_125 = arith.constant 0 : index
    %287 = vector.load %arg4[%c1_123, %c0_124, %c0_125] : memref<2x32x64xf32, #tpu.memory_space<vmem>>, vector<1x32x64xf32>
    %288 = vector.shape_cast %287 : vector<1x32x64xf32> to vector<32x64xf32>
    %cst_126 = arith.constant dense<0.000000e+00> : vector<16x64xf32>
    %289 = tpu.matmul %286, %288, %cst_126 {dimension_numbers = #tpu.dot_dimension_numbers<[1], [0], [0], [1], [0, 0, 1, 1], [], []>} : vector<16x32xf32>, vector<32x64xf32>, vector<16x64xf32> -> vector<16x64xf32>
    %c57 = arith.constant 57 : index
    %c0_127 = arith.constant 0 : index
    %290 = vector.load %arg6[%c57, %c0_127] : memref<61x128xf32, #tpu.memory_space<vmem>>, vector<1x64xf32>
    %291 = vector.broadcast %290 : vector<1x64xf32> to vector<16x64xf32>
    %292 = arith.addf %289, %291 : vector<16x64xf32>
    %293 = arith.mulf %292, %292 : vector<16x64xf32>
    %294 = arith.mulf %292, %293 : vector<16x64xf32>
    %cst_128 = arith.constant 4.471500e-02 : f32
    %295 = vector.broadcast %cst_128 : f32 to vector<16x64xf32>
    %296 = arith.mulf %295, %294 : vector<16x64xf32>
    %297 = arith.addf %292, %296 : vector<16x64xf32>
    %cst_129 = arith.constant 0.797884583 : f32
    %298 = vector.broadcast %cst_129 : f32 to vector<16x64xf32>
    %299 = arith.mulf %298, %297 : vector<16x64xf32>
    %300 = math.tanh %299 : vector<16x64xf32>
    %cst_130 = arith.constant 1.000000e+00 : f32
    %301 = vector.broadcast %cst_130 : f32 to vector<16x64xf32>
    %302 = arith.addf %301, %300 : vector<16x64xf32>
    %cst_131 = arith.constant 5.000000e-01 : f32
    %303 = vector.broadcast %cst_131 : f32 to vector<16x64xf32>
    %304 = arith.mulf %303, %302 : vector<16x64xf32>
    %305 = arith.mulf %292, %304 : vector<16x64xf32>
    %c1_132 = arith.constant 1 : index
    %c0_133 = arith.constant 0 : index
    %c0_134 = arith.constant 0 : index
    %306 = vector.load %arg5[%c1_132, %c0_133, %c0_134] : memref<2x64x32xf32, #tpu.memory_space<vmem>>, vector<1x64x32xf32>
    %307 = vector.shape_cast %306 : vector<1x64x32xf32> to vector<64x32xf32>
    %cst_135 = arith.constant dense<0.000000e+00> : vector<16x32xf32>
    %308 = tpu.matmul %305, %307, %cst_135 {dimension_numbers = #tpu.dot_dimension_numbers<[1], [0], [0], [1], [0, 0, 1, 1], [], []>} : vector<16x64xf32>, vector<64x32xf32>, vector<16x32xf32> -> vector<16x32xf32>
    %c58 = arith.constant 58 : index
    %c0_136 = arith.constant 0 : index
    %309 = vector.load %arg6[%c58, %c0_136] : memref<61x128xf32, #tpu.memory_space<vmem>>, vector<1x32xf32>
    %310 = vector.broadcast %309 : vector<1x32xf32> to vector<16x32xf32>
    %311 = arith.addf %308, %310 : vector<16x32xf32>
    %312 = arith.addf %286, %311 : vector<16x32xf32>
    %c59 = arith.constant 59 : index
    %c0_137 = arith.constant 0 : index
    %313 = vector.load %arg6[%c59, %c0_137] : memref<61x128xf32, #tpu.memory_space<vmem>>, vector<1x32xf32>
    %c60 = arith.constant 60 : index
    %c0_138 = arith.constant 0 : index
    %314 = vector.load %arg6[%c60, %c0_138] : memref<61x128xf32, #tpu.memory_space<vmem>>, vector<1x32xf32>
    %cst_139 = arith.constant dense<0.000000e+00> : vector<16xf32>
    %315 = vector.multi_reduction <add>, %312, %cst_139 [1] : vector<16x32xf32> to vector<16xf32>
    %316 = vector.shape_cast %315 : vector<16xf32> to vector<16x1xf32>
    %cst_140 = arith.constant 3.200000e+01 : f32
    %317 = vector.broadcast %cst_140 : f32 to vector<16x1xf32>
    %318 = arith.divf %316, %317 : vector<16x1xf32>
    %319 = arith.mulf %312, %312 : vector<16x32xf32>
    %cst_141 = arith.constant dense<0.000000e+00> : vector<16xf32>
    %320 = vector.multi_reduction <add>, %319, %cst_141 [1] : vector<16x32xf32> to vector<16xf32>
    %321 = vector.shape_cast %320 : vector<16xf32> to vector<16x1xf32>
    %cst_142 = arith.constant 3.200000e+01 : f32
    %322 = vector.broadcast %cst_142 : f32 to vector<16x1xf32>
    %323 = arith.divf %321, %322 : vector<16x1xf32>
    %324 = arith.mulf %318, %318 : vector<16x1xf32>
    %325 = arith.subf %323, %324 : vector<16x1xf32>
    %326 = vector.broadcast %318 : vector<16x1xf32> to vector<16x32xf32>
    %327 = arith.subf %312, %326 : vector<16x32xf32>
    %cst_143 = arith.constant 9.99999996E-13 : f32
    %328 = vector.broadcast %cst_143 : f32 to vector<16x1xf32>
    %329 = arith.addf %325, %328 : vector<16x1xf32>
    %330 = math.rsqrt %329 : vector<16x1xf32>
    %331 = vector.broadcast %330 : vector<16x1xf32> to vector<16x32xf32>
    %332 = vector.broadcast %313 : vector<1x32xf32> to vector<16x32xf32>
    %333 = arith.mulf %331, %332 : vector<16x32xf32>
    %334 = arith.mulf %327, %333 : vector<16x32xf32>
    %335 = vector.broadcast %314 : vector<1x32xf32> to vector<16x32xf32>
    %336 = arith.addf %334, %335 : vector<16x32xf32>
    %337 = vector.shape_cast %336 : vector<16x32xf32> to vector<2x8x32xf32>
    %338 = vector.extract_strided_slice %337 {offsets = [0, 0, 0], sizes = [2, 1, 32], strides = [1, 1, 1]} : vector<2x8x32xf32> to vector<2x1x32xf32>
    %339 = vector.shape_cast %338 : vector<2x1x32xf32> to vector<2x32xf32>
    %c3_144 = arith.constant 3 : index
    %c0_145 = arith.constant 0 : index
    %340 = vector.load %arg6[%c3_144, %c0_145] : memref<61x128xf32, #tpu.memory_space<vmem>>, vector<32x128xf32>
    %cst_146 = arith.constant dense<0.000000e+00> : vector<2x128xf32>
    %341 = tpu.matmul %339, %340, %cst_146 {dimension_numbers = #tpu.dot_dimension_numbers<[1], [0], [0], [1], [0, 0, 1, 1], [], []>} : vector<2x32xf32>, vector<32x128xf32>, vector<2x128xf32> -> vector<2x128xf32>
    %c2_147 = arith.constant 2 : index
    %c0_148 = arith.constant 0 : index
    %342 = vector.load %arg6[%c2_147, %c0_148] : memref<61x128xf32, #tpu.memory_space<vmem>>, vector<1x128xf32>
    %343 = vector.broadcast %342 : vector<1x128xf32> to vector<2x128xf32>
    %344 = arith.addf %341, %343 : vector<2x128xf32>
    %cst_149 = arith.constant 0.000000e+00 : f32
    %345 = vector.broadcast %cst_149 : f32 to vector<2x128xf32>
    %346 = arith.maximumf %344, %345 : vector<2x128xf32>
    %347 = arith.negf %346 : vector<2x128xf32>
    %348 = math.exp %347 : vector<2x128xf32>
    %cst_150 = arith.constant 1.000000e+00 : f32
    %349 = vector.broadcast %cst_150 : f32 to vector<2x128xf32>
    %350 = arith.addf %349, %348 : vector<2x128xf32>
    %351 = arith.divf %349, %350 : vector<2x128xf32>
    %c0_151 = arith.constant 0 : index
    %c0_152 = arith.constant 0 : index
    %352 = vector.load %arg7[%c0_151, %c0_152] : memref<2x128xf32, #tpu.memory_space<vmem>>, vector<2x128xf32>
    tpu.vector_store %arg7[%c0_151, %c0_152], %351 {strides = array<i32>} : memref<2x128xf32, #tpu.memory_space<vmem>>, vector<2x128xf32>,
    return
  }
}

</mosaic_0001>

<bundles_post_ra>
// kernel: unimodal_dbert_forward.1
= control target key start
LH: loop header
LB: loop body
LE: loop exit
PB: predicated region body
PF: predicated region fallthrough
CT: control target
= control target key end

     0   :  { %vm30_vm0 = vcmask 261120   ;;  %v3991_v54 = vmov 0.0   ;;  %vm3992_vm1 = vmmov 0   ;;  %vm370_vm2 = vcmask 130048   ;;  %s4639_s0 = inlined_call_operand.vmem [shape: f32[16,32], index: 0, kind: input, shape index: {}]   ;;  %s4640_s2 = inlined_call_operand.vmem [shape: f32[12,32,16], index: 2, kind: input, shape index: {}]   ;;  %s4641_s6 = inlined_call_operand.vmem [shape: f32[61,128], index: 6, kind: input, shape index: {}]   ;;  %s4642_s1 = inlined_call_operand.vmem [shape: f32[2,8], index: 1, kind: input, shape index: {}]   ;;  %s4643_s3 = inlined_call_operand.vmem [shape: f32[2,32,32], index: 3, kind: input, shape index: {}]   ;;  %s4644_s4 = inlined_call_operand.vmem [shape: f32[2,32,64], index: 4, kind: input, shape index: {}]   ;;  %s4645_s5 = inlined_call_operand.vmem [shape: f32[2,64,32], index: 5, kind: input, shape index: {}]   ;;  %s4646_s7 = inlined_call_operand.vmem [shape: f32[2,128], index: 7, kind: output, shape index: {}]  }
   0x1   :  { %v26_v0 = vld [vmem:[%s4639_s0] sm:$0xff]  ;;  %v4041_v1 = vld [vmem:[%s4639_s0 + $0x8] sm:$0xff]  ;;  %v103_v8 = vld [vmem:[%s4640_s2 + $0x18] sm:$0xff]  ;;  %vm523_vm3 = vcmask 64512   ;;  %s3994_s0 = smov 16   ;;  %vm1534_vm4 = vcmask 523264  }
   0x2   :  { %v31_v2 = vsel %vm30_vm0, %v26_v0, 0.0  ;;  %v40_v3 = vmul.f32 %v26_v0, %v26_v0  ;;  %v41_v4 = vmul.f32 %v4041_v1, %v4041_v1  ;;  %v34_v6 = vsel %vm30_vm0, %v4041_v1, 0.0  ;;  %3618 = vmatprep.subr.mxu0 %v103_v8  ;;  %v3322_v9 = vld [vmem:[%s4640_s2 + $0x58] sm:$0xff]  ;;  %v102_v10 = vld [vmem:[%s4640_s2 + $0x10] sm:$0xff]  ;;  %v101_v12 = vld [vmem:[%s4640_s2 + $0x8] sm:$0xff] }
   0x3   :  { %32 = vadd.xlane.f32.xlu0 %v31_v2  ;;  %3619 = vmatpush3.msra.mxu0 %v103_v8  ;;  %v3321_v11 = vld [vmem:[%s4640_s2 + $0x50] sm:$0xff]  ;;  %v3320_v13 = vld [vmem:[%s4640_s2 + $0x48] sm:$0xff]  ;;  %v100_v14 = vld [vmem:[%s4640_s2] sm:$0xff]  ;;  %vm3227_vm5 = vcmask 1041409  }
   0x4   :  { %v42_v5 = vsel %vm30_vm0, %v40_v3, 0.0  ;;  %v45_v7 = vsel %vm30_vm0, %v41_v4, 0.0  ;;  %3629 = vmatprep.subr.mxu1 %v3322_v9  ;;  %3620 = vmatprep.subr.mxu0 %v102_v10  ;;  %v3319_v15 = vld [vmem:[%s4640_s2 + $0x40] sm:$0xff]  ;;  %v3329_v16 = vld [vmem:[%s4640_s2 + $0x98] sm:$0xff]  ;;  %v3328_v43 = vld [vmem:[%s4640_s2 + $0x90] sm:$0xff] }
   0x5   :  { %43 = vadd.xlane.f32.xlu1 %v42_v5  ;;  %3630 = vmatpush3.msra.mxu1 %v3322_v9  ;;  %v3313_v31 = vld [vmem:[%s4641_s6] ss:$0 sm:$0xff]  ;;  %v3314_v35 = vld [vmem:[%s4641_s6 + $0x1] ss:$0 sm:$0xff]  ;;  %v3327_v44 = vld [vmem:[%s4640_s2 + $0x88] sm:$0xff] }
   0x6   :  { %3621 = vmatpush3.msra.mxu0 %v102_v10  ;;  %3631 = vmatprep.subr.mxu1 %v3321_v11  ;;  %v3326_v45 = vld [vmem:[%s4640_s2 + $0x80] sm:$0xff]  ;;  %v3342_v46 = vld [vmem:[%s4640_s2 + $0x38] sm:$0xff]  ;;  %v3341_v47 = vld [vmem:[%s4640_s2 + $0x30] sm:$0xff] }
   0x7   :  { %35 = vadd.xlane.f32.xlu0 %v34_v6  ;;  %3622 = vmatprep.subr.mxu0 %v101_v12  ;;  %v3340_v48 = vld [vmem:[%s4640_s2 + $0x28] sm:$0xff]  ;;  %v3339_v49 = vld [vmem:[%s4640_s2 + $0x20] sm:$0xff]  ;;  %v3356_v50 = vld [vmem:[%s4640_s2 + $0xb8] sm:$0xff] }
   0x8   :  { %3632 = vmatpush3.msra.mxu1 %v3321_v11  ;;  %3623 = vmatpush3.msra.mxu0 %v101_v12  ;;  %v3355_v51 = vld [vmem:[%s4640_s2 + $0xb0] sm:$0xff]  ;;  %v3354_v52 = vld [vmem:[%s4640_s2 + $0xa8] sm:$0xff]  ;;  %v3353_v53 = vld [vmem:[%s4640_s2 + $0xa0] sm:$0xff] }
   0x9   :  { %46 = vadd.xlane.f32.xlu1 %v45_v7  ;;  %3633 = vmatprep.subr.mxu1 %v3320_v13  ;;  %v3323_v57 = vld [vmem:[%s4641_s6 + $0x25] ss:$0 sm:$0xff]  ;;  %v3316_v61 = vld [vmem:[%s4641_s6 + $0x23] ss:$0 sm:$0xff]  ;;  %v3330_v63 = vld [vmem:[%s4641_s6 + $0x27] ss:$0 sm:$0xff] }
   0xa   :  { %3624 = vmatprep.subr.mxu0 %v100_v14  ;;  %3634 = vmatpush3.msra.mxu1 %v3320_v13  ;;  %v3357_v8 = vld [vmem:[%s4641_s6 + $0x28] ss:$0 sm:$0xff]  ;;  %v3993_v13 = vmov 1966171168  }
   0xb   :  { %3625 = vmatpush3.msra.mxu0 %v100_v14  ;;  %3635 = vmatprep.subr.mxu1 %v3319_v15  ;;  %v79_v14 = vunpack.c.l.s4 %v3993_v13 }
   0xc   :  { %3636 = vmatpush3.msra.mxu1 %v3319_v15  ;;  %3640 = vmatprep.subr.mxu0 %v3329_v16  ;;  %v81_v15 = vlaneseq }
   0xd   :  { %3651 = vmatprep.subr.mxu1 %v3991_v54 }
  0x8c   :  { %v33_v17 = vpop.xlane.xlu0 %32 }
  0x8d   :  { %v38_v18 = vmul.f32 0.03125, %v33_v17 }
  0x8e   :  { %v44_v19 = vpop.xlane.xlu1 %43 }
  0x8f   :  { %v50_v20 = vmul.f32 %v38_v18, %v38_v18  ;;  %v48_v21 = vmul.f32 0.03125, %v44_v19  ;;  %v54_v33 = vsub.f32 %v26_v0, %v38_v18  ;;  %v80_v18 = vunpack.c.0.s8 %v79_v14 }
  0x90   :  { %v36_v22 = vpop.xlane.xlu0 %35  ;;  %v82_v19 = vshrl.u32 %v81_v15, 7 }
  0x91   :  { %v52_v23 = vsub.f32 %v48_v21, %v50_v20  ;;  %v39_v24 = vmul.f32 0.03125, %v36_v22 }
  0x92   :  { %v47_v25 = vpop.xlane.xlu1 %46  ;;  %v83_v21 = vsub.s32 %v80_v18, %v82_v19 }
  0x93   :  { %v56_v26 = vadd.f32 1e-12, %v52_v23  ;;  %v51_v27 = vmul.f32 %v39_v24, %v39_v24  ;;  %v49_v28 = vmul.f32 0.03125, %v47_v25  ;;  %v55_v39 = vsub.f32 %v4041_v1, %v39_v24 }
  0x94   :  { %v362_v24 = vsub.s32 0, %v82_v19 }
  0x95   :  { %3927 = vrsqrt.f32 %v56_v26  ;;  %v53_v29 = vsub.f32 %v49_v28, %v51_v27 }
  0x97   :  { %v57_v30 = vadd.f32 1e-12, %v53_v29 }
  0x99   :  { %3929 = vrsqrt.f32 %v57_v30 }
  0xa2   :  { %v3928_v32 = vpop.eup %3927 }
  0xa3   :  { %v64_v34 = vmul.f32 %v3928_v32, %v3313_v31 }
  0xa5   :  { %v66_v36 = vmul.f32 %v64_v34, %v54_v33 }
  0xa6   :  { %v3930_v37 = vpop.eup %3929 }
  0xa7   :  { %v4083_v38 = vadd.f32 %v3314_v35, %v66_v36  ;;  %v65_v40 = vmul.f32 %v3930_v37, %v3313_v31 }
  0xa9   :  { %v67_v41 = vmul.f32 %v65_v40, %v55_v39  ;;  %3626 = vmatprep.mubr.msk.f32.mxu0 %vm30_vm0, %v4083_v38  ;;  %3637 = vmatprep.mubr.msk.f32.mxu1 %vm30_vm0, %v4083_v38 }
  0xab   :  { %v4090_v42 = vadd.f32 %v3314_v35, %v67_v41 }
  0xad   :  { %3627 = vmatmul.mubr.msk.f32.vlgmr.msra.gmra.mxu0 %vm30_vm0, %v4090_v42  ;;  %3638 = vmatmul.mubr.msk.f32.vlgmr.msra.gmra.mxu1 %vm30_vm0, %v4090_v42 }
  0xae   :  { %3641 = vmatpush3.msra.mxu0 %v3329_v16  ;;  %3648 = vmatprep.mubr.msk.f32.mxu0 %vm30_vm0, %v4083_v38  ;;  %v74_v16 = vld [vmem:[%s4642_s1] sm:$0x3] }
  0xaf   :  { %3642 = vmatprep.subr.mxu0 %v3328_v43  ;;  %3653 = vmatprep.mubr.msk.f32.mxu1 %vm3992_vm1, %v3991_v54  ;;  %v3315_v17 = vadd.f32 -1.0, %v74_v16 }
  0xb0   :  { %3643 = vmatpush3.msra.mxu0 %v3328_v43 }
  0xb1   :  { %3644 = vmatprep.subr.mxu0 %v3327_v44  ;;  %v76_v20 = vmul.f32 1e+09, %v3315_v17 }
  0xb2   :  { %3645 = vmatpush3.msra.mxu0 %v3327_v44 }
  0xb3   :  { %3646 = vmatprep.subr.mxu0 %v3326_v45  ;;  %v84_v22 = vrot.slane %v76_v20, %v83_v21 }
  0xb4   :  { %3647 = vmatpush3.msra.mxu0 %v3326_v45 }
  0xb5   :  { %3649 = vmatmul.mubr.msk.f32.vlgmr.msra.gmra.mxu0 %vm30_vm0, %v4090_v42  ;;  %3671 = vmatprep.subr.mxu0 %v3342_v46  ;;  %v92_v23 = vrot.slane %v84_v22, %v83_v21  ;;  %v85_v25 = vcombine.high %v84_v22, %v84_v22 }
  0xb6   :  { %3672 = vmatpush3.msra.mxu0 %v3342_v46  ;;  %3679 = vmatprep.mubr.msk.f32.mxu0 %vm30_vm0, %v4083_v38 }
  0xb7   :  { %3673 = vmatprep.subr.mxu0 %v3341_v47  ;;  %v4181_v26 = vrot.slane %v92_v23, %v362_v24  ;;  %v99_v27 = vrot.slane %v85_v25, %v83_v21 }
  0xb8   :  { %3674 = vmatpush3.msra.mxu0 %v3341_v47 }
  0xb9   :  { %3675 = vmatprep.subr.mxu0 %v3340_v48  ;;  %v4184_v30 = vrot.slane %v99_v27, %v362_v24 }
  0xba   :  { %3676 = vmatpush3.msra.mxu0 %v3340_v48 }
  0xbb   :  { %3677 = vmatprep.subr.mxu0 %v3339_v49 }
  0xbc   :  { %3678 = vmatpush3.msra.mxu0 %v3339_v49 }
  0xbd   :  { %3680 = vmatmul.mubr.msk.f32.vlgmr.msra.gmra.mxu0 %vm30_vm0, %v4090_v42  ;;  %3693 = vmatprep.subr.mxu0 %v3356_v50 }
  0xbe   :  { %3694 = vmatpush3.msra.mxu0 %v3356_v50  ;;  %3701 = vmatprep.mubr.msk.f32.mxu0 %vm30_vm0, %v4083_v38 }
  0xbf   :  { %3695 = vmatprep.subr.mxu0 %v3355_v51 }
  0xc0   :  { %3696 = vmatpush3.msra.mxu0 %v3355_v51 }
  0xc1   :  { %3697 = vmatprep.subr.mxu0 %v3354_v52 }
  0xc2   :  { %3698 = vmatpush3.msra.mxu0 %v3354_v52 }
  0xc3   :  { %3699 = vmatprep.subr.mxu0 %v3353_v53 }
  0xc4   :  { %3700 = vmatpush3.msra.mxu0 %v3353_v53  ;;  %v3349_v53 = vld [vmem:[%s4640_s2 + $0x78] sm:$0xff] }
  0xc5   :  { %3702 = vmatmul.mubr.msk.f32.vlgmr.msra.gmra.mxu0 %vm30_vm0, %v4090_v42  ;;  %3714 = vmatprep.subr.mxu0 %v3991_v54 }
  0xc6   :  { %3716 = vmatprep.mubr.msk.f32.mxu0 %vm3992_vm1, %v3991_v54 }
 0x16d   :  { %v3628_v55 = vpop.f32.mrf.mxu0  ;;  %v3639_v56 = vpop.f32.mrf.mxu1 }
 0x16e   :  { %v272_v0 = vadd.f32 %v3639_v56, %v3323_v57  ;;  %v187_v3 = vadd.f32 %v3628_v55, %v3316_v61 }
 0x16f   :  { %v266_v58 = vpop.f32.mrf.mxu1  ;;  %v181_v59 = vpop.f32.mrf.mxu0 }
 0x170   :  { %v267_v60 = vadd.f32 %v3323_v57, %v266_v58  ;;  %v182_v62 = vadd.f32 %v3316_v61, %v181_v59  ;;  %v3348_v57 = vld [vmem:[%s4640_s2 + $0x70] sm:$0xff]  ;;  %v3347_v58 = vld [vmem:[%s4640_s2 + $0x68] sm:$0xff]  ;;  %v3346_v59 = vld [vmem:[%s4640_s2 + $0x60] sm:$0xff] }
 0x172   :  { %3652 = vmatpush3.xpose.msk.msra.mxu1 %vm370_vm2, %v267_v60 }
 0x173   :  { %3656 = vmatprep.subr.mxu1 %v3991_v54 }
 0x175   :  { %v3650_v1 = vpop.f32.mrf.mxu0  ;;  %3654 = vmatmul.mubr.msk.f32.vlgmr.msra.gmra.mxu1 %vm370_vm2, %v182_v62 }
 0x176   :  { %v4159_v2 = vadd.f32 %v3650_v1, %v3330_v63  ;;  %3657 = vmatpush3.xpose.msk.msra.mxu1 %vm370_vm2, %v272_v0  ;;  %3658 = vmatprep.mubr.msk.f32.mxu1 %vm3992_vm1, %v3991_v54  ;;  %v3350_v1 = vld [vmem:[%s4641_s6 + $0x26] ss:$0 sm:$0xff] }
 0x177   :  { %v351_v4 = vpop.f32.mrf.mxu0  ;;  %3661 = vmatprep.subr.mxu1 %v3991_v54 }
 0x178   :  { %v352_v5 = vadd.f32 %v3330_v63, %v351_v4  ;;  %v3343_v4 = vld [vmem:[%s4641_s6 + $0x24] ss:$0 sm:$0xff] }
 0x179   :  { %3659 = vmatmul.mubr.msk.f32.vlgmr.msra.gmra.mxu1 %vm370_vm2, %v187_v3 }
 0x17a   :  { %3662 = vmatpush3.msra.mxu1 %v352_v5  ;;  %3663 = vmatprep.mubr.msk.f32.mxu1 %vm3992_vm1, %v3991_v54 }
 0x17b   :  { %3666 = vmatprep.subr.mxu1 %v3991_v54 }
 0x17d   :  { %v4169_v6 = vpop.f32.mrf.mxu0 }
 0x17f   :  { %v4171_v7 = vpop.f32.mrf.mxu0 }
 0x180   :  { %v769_v5 = vadd.f32 %v3343_v4, %v4171_v7 }
 0x185   :  { %v3703_v9 = vpop.f32.mrf.mxu0 }
 0x186   :  { %v4176_v10 = vadd.f32 %v3703_v9, %v3357_v8  ;;  %v774_v9 = vadd.f32 %v4169_v6, %v3343_v4 }
 0x187   :  { %v938_v11 = vpop.f32.mrf.mxu0 }
 0x188   :  { %v939_v12 = vadd.f32 %v3357_v8, %v938_v11 }
 0x18a   :  { %3715 = vmatpush3.msra.mxu0 %v939_v12 }
 0x235   :  { %v443_v28 = vpop.f32.mrf.mxu1 }
 0x236   :  { %v444_v29 = vadd.f32 %v443_v28, %v4181_v26 }
 0x237   :  { %v3655_v31 = vpop.f32.mrf.mxu1 }
 0x238   :  { %v524_v32 = vsel %vm523_vm3, %v444_v29, -inf }
 0x239   :  { %525 = vmax.xlane.f32.xlu0 %v524_v32  ;;  %v519_v33 = vpop.f32.mrf.mxu1 }
 0x23a   :  { %v520_v34 = vadd.f32 %v519_v33, %v4184_v30 }
 0x23b   :  { %v3660_v35 = vpop.f32.mrf.mxu1 }
 0x23c   :  { %v527_v36 = vsel %vm523_vm3, %v520_v34, -inf  ;;  %v1279_v35 = vld [vmem:[%s4643_s3 + $0x10] sm:$0xff] }
 0x23d   :  { %528 = vmax.xlane.f32.xlu1 %v527_v36  ;;  %v1278_v36 = vld [vmem:[%s4643_s3 + $0x8] sm:$0xff] }
 0x2c2   :  { %v526_v37 = vpop.xlane.xlu0 %525 }
 0x2c3   :  { %v530_v39 = vsub.f32 %v444_v29, %v526_v37  ;;  %v1277_v37 = vld [vmem:[%s4643_s3] sm:$0xff] }
 0x2c5   :  { %v532_v40 = vmul.f32 1.442695, %v530_v39 }
 0x2c6   :  { %v529_v41 = vpop.xlane.xlu1 %528 }
 0x2c7   :  { %3931 = vpow2.f32 %v532_v40  ;;  %v531_v43 = vsub.f32 %v520_v34, %v529_v41  ;;  %v1280_v34 = vld [vmem:[%s4643_s3 + $0x18] sm:$0xff] }
 0x2c8   :  { %3724 = vmatprep.subr.mxu0 %v1280_v34 }
 0x2c9   :  { %v534_v44 = vmul.f32 1.442695, %v531_v43 }
 0x2cb   :  { %3933 = vpow2.f32 %v534_v44 }
 0x2d4   :  { %v3932_v45 = vpop.eup %3931 }
 0x2d5   :  { %v536_v46 = vsel %vm523_vm3, %v3932_v45, 0.0 }
 0x2d6   :  { %537 = vadd.xlane.f32.xlu0 %v536_v46 }
 0x2d8   :  { %v3934_v47 = vpop.eup %3933 }
 0x2d9   :  { %v539_v48 = vsel %vm523_vm3, %v3934_v47, 0.0 }
 0x2da   :  { %540 = vadd.xlane.f32.xlu1 %v539_v48  ;;  %v3366_v48 = vld [vmem:[%s4641_s6 + $0x29] ss:$0 sm:$0xff] }
 0x35f   :  { %v538_v49 = vpop.xlane.xlu0 %537 }
 0x360   :  { %3935 = vrcp.f32 %v538_v49 }
 0x363   :  { %v541_v50 = vpop.xlane.xlu1 %540 }
 0x364   :  { %3937 = vrcp.f32 %v541_v50 }
 0x36d   :  { %v3936_v51 = vpop.eup %3935 }
 0x36e   :  { %v544_v52 = vmul.f32 %v3936_v51, %v3932_v45 }
 0x370   :  { %3664 = vmatmul.mubr.msk.f32.vlgmr.msra.gmra.mxu1 %vm523_vm3, %v544_v52 }
 0x371   :  { %v3938_v55 = vpop.eup %3937  ;;  %3667 = vmatpush3.msra.mxu1 %v4159_v2  ;;  %3668 = vmatprep.mubr.msk.f32.mxu1 %vm3992_vm1, %v3991_v54 }
 0x372   :  { %3682 = vmatprep.subr.mxu1 %v3349_v53  ;;  %v545_v56 = vmul.f32 %v3938_v55, %v3934_v47 }
 0x374   :  { %3669 = vmatmul.mubr.msk.f32.vlgmr.msra.gmra.mxu1 %vm523_vm3, %v545_v56 }
 0x375   :  { %3683 = vmatpush3.msra.mxu1 %v3349_v53  ;;  %3690 = vmatprep.mubr.msk.f32.mxu1 %vm30_vm0, %v4083_v38 }
 0x376   :  { %3684 = vmatprep.subr.mxu1 %v3348_v57 }
 0x377   :  { %3685 = vmatpush3.msra.mxu1 %v3348_v57 }
 0x378   :  { %3686 = vmatprep.subr.mxu1 %v3347_v58 }
 0x379   :  { %3687 = vmatpush3.msra.mxu1 %v3347_v58 }
 0x37a   :  { %3688 = vmatprep.subr.mxu1 %v3346_v59 }
 0x37b   :  { %3689 = vmatpush3.msra.mxu1 %v3346_v59 }
 0x37c   :  { %3691 = vmatmul.mubr.msk.f32.vlgmr.msra.gmra.mxu1 %vm30_vm0, %v4090_v42  ;;  %3704 = vmatprep.subr.mxu1 %v3991_v54 }
 0x37d   :  { %3706 = vmatprep.mubr.msk.f32.mxu1 %vm3992_vm1, %v3991_v54 }
 0x430   :  { %v4215_v60 = vpop.f32.mrf.mxu1 }
 0x432   :  { %v3665_v61 = vpop.f32.mrf.mxu1 }
 0x434   :  { %v4217_v62 = vpop.f32.mrf.mxu1 }
 0x436   :  { %v3670_v63 = vpop.f32.mrf.mxu1 }
 0x437   :  { %v1413_v63 = vld [vmem:[%s4644_s4] sm:$0xff] }
 0x43c   :  { %v3692_v0 = vpop.f32.mrf.mxu1 }
 0x43d   :  { %v859_v8 = vadd.f32 %v3692_v0, %v3350_v1 }
 0x43e   :  { %v853_v2 = vpop.f32.mrf.mxu1 }
 0x43f   :  { %v854_v3 = vadd.f32 %v3350_v1, %v853_v2 }
 0x441   :  { %3705 = vmatpush3.xpose.msk.msra.mxu1 %vm370_vm2, %v854_v3 }
 0x442   :  { %3709 = vmatprep.subr.mxu1 %v3991_v54 }
 0x444   :  { %3707 = vmatmul.mubr.msk.f32.vlgmr.msra.gmra.mxu1 %vm370_vm2, %v769_v5 }
 0x445   :  { %3710 = vmatpush3.xpose.msk.msra.mxu1 %vm370_vm2, %v859_v8  ;;  %3711 = vmatprep.mubr.msk.f32.mxu1 %vm3992_vm1, %v3991_v54 }
 0x446   :  { %3719 = vmatprep.subr.mxu1 %v3991_v54 }
 0x448   :  { %3712 = vmatmul.mubr.msk.f32.vlgmr.msra.gmra.mxu1 %vm370_vm2, %v774_v9 }
 0x449   :  { %3720 = vmatpush3.msra.mxu1 %v4176_v10  ;;  %3721 = vmatprep.mubr.msk.f32.mxu1 %vm3992_vm1, %v3991_v54 }
 0x504   :  { %v1019_v7 = vpop.f32.mrf.mxu1 }
 0x505   :  { %v1020_v11 = vadd.f32 %v1019_v7, %v4181_v26 }
 0x506   :  { %v3708_v12 = vpop.f32.mrf.mxu1 }
 0x507   :  { %v1099_v13 = vsel %vm523_vm3, %v1020_v11, -inf }
 0x508   :  { %1100 = vmax.xlane.f32.xlu0 %v1099_v13  ;;  %v1095_v14 = vpop.f32.mrf.mxu1 }
 0x509   :  { %v1096_v15 = vadd.f32 %v1095_v14, %v4184_v30 }
 0x50a   :  { %v3713_v6 = vpop.f32.mrf.mxu1 }
 0x50b   :  { %v1102_v16 = vsel %vm523_vm3, %v1096_v15, -inf  ;;  %v3369_v6 = vld [vmem:[%s4641_s6 + $0x2a] ss:$0 sm:$0xff] }
 0x50c   :  { %1103 = vmax.xlane.f32.xlu1 %v1102_v16 }
 0x591   :  { %v1101_v17 = vpop.xlane.xlu0 %1100 }
 0x592   :  { %v1105_v18 = vsub.f32 %v1020_v11, %v1101_v17 }
 0x594   :  { %v1107_v10 = vmul.f32 1.442695, %v1105_v18 }
 0x595   :  { %v1104_v19 = vpop.xlane.xlu1 %1103 }
 0x596   :  { %3939 = vpow2.f32 %v1107_v10  ;;  %v1106_v20 = vsub.f32 %v1096_v15, %v1104_v19  ;;  %v3370_v19 = vld [vmem:[%s4641_s6 + $0x2b] ss:$0 sm:$0xff] }
 0x598   :  { %v1109_v21 = vmul.f32 1.442695, %v1106_v20 }
 0x59a   :  { %3941 = vpow2.f32 %v1109_v21 }
 0x5a3   :  { %v3940_v22 = vpop.eup %3939 }
 0x5a4   :  { %v1111_v23 = vsel %vm523_vm3, %v3940_v22, 0.0 }
 0x5a5   :  { %1112 = vadd.xlane.f32.xlu0 %v1111_v23 }
 0x5a7   :  { %v3942_v24 = vpop.eup %3941 }
 0x5a8   :  { %v1114_v25 = vsel %vm523_vm3, %v3942_v24, 0.0 }
 0x5a9   :  { %1115 = vadd.xlane.f32.xlu1 %v1114_v25 }
 0x62e   :  { %v1113_v27 = vpop.xlane.xlu0 %1112 }
 0x62f   :  { %3943 = vrcp.f32 %v1113_v27  ;;  %v1528_v27 = vld [vmem:[%s4645_s5 + $0x38] sm:$0xff] }
 0x632   :  { %v1116_v28 = vpop.xlane.xlu1 %1115 }
 0x633   :  { %3945 = vrcp.f32 %v1116_v28  ;;  %v1527_v28 = vld [vmem:[%s4645_s5 + $0x30] sm:$0xff] }
 0x63c   :  { %v3944_v29 = vpop.eup %3943 }
 0x63d   :  { %v1119_v31 = vmul.f32 %v3944_v29, %v3940_v22  ;;  %v1526_v29 = vld [vmem:[%s4645_s5 + $0x28] sm:$0xff] }
 0x63f   :  { %3717 = vmatmul.mubr.msk.f32.vlgmr.msra.gmra.mxu0 %vm523_vm3, %v1119_v31  ;;  %v1525_v31 = vld [vmem:[%s4645_s5 + $0x20] sm:$0xff] }
 0x640   :  { %v3946_v32 = vpop.eup %3945  ;;  %3725 = vmatpush3.msra.mxu0 %v1280_v34  ;;  %v1522_v34 = vld [vmem:[%s4645_s5 + $0x8] sm:$0xff] }
 0x641   :  { %v1120_v33 = vmul.f32 %v3946_v32, %v3942_v24  ;;  %3726 = vmatprep.subr.mxu0 %v1279_v35  ;;  %v1524_v32 = vld [vmem:[%s4645_s5 + $0x18] sm:$0xff] }
 0x642   :  { %3727 = vmatpush3.msra.mxu0 %v1279_v35  ;;  %v1521_v35 = vld [vmem:[%s4645_s5] sm:$0xff] }
 0x643   :  { %3722 = vmatmul.mubr.msk.f32.vlgmr.msra.gmra.mxu1 %vm523_vm3, %v1120_v33  ;;  %3728 = vmatprep.subr.mxu0 %v1278_v36  ;;  %v1523_v33 = vld [vmem:[%s4645_s5 + $0x10] sm:$0xff] }
 0x644   :  { %3729 = vmatpush3.msra.mxu0 %v1278_v36  ;;  %v3371_v36 = vld [vmem:[%s4641_s6 + $0x2c] ss:$0 sm:$0xff] }
 0x645   :  { %3730 = vmatprep.subr.mxu0 %v1277_v37 }
 0x646   :  { %3731 = vmatpush3.msra.mxu0 %v1277_v37 }
 0x647   :  { %3746 = vmatprep.subr.mxu0 %v1528_v27 }
 0x6ff   :  { %v1190_v39 = vpop.f32.mrf.mxu0 }
 0x700   :  { %1269 = vrot.lane.b32.xlu0 %v1190_v39, %s3994_s0 }
 0x701   :  { %v3718_v40 = vpop.f32.mrf.mxu0 }
 0x703   :  { %v1263_v41 = vpop.f32.mrf.mxu1 }
 0x704   :  { %1271 = vrot.lane.b32.xlu1 %v1263_v41, %s3994_s0 }
 0x705   :  { %v3723_v43 = vpop.f32.mrf.mxu1 }
 0x772   :  { %v1270_v44 = vpop.permute.xlu0 %1269 }
 0x773   :  { %v1275_v45 = vsel %vm370_vm2, %v4215_v60, %v1270_v44 }
 0x774   :  { %3732 = vmatprep.mubr.msk.f32.mxu0 %vm30_vm0, %v1275_v45 }
 0x776   :  { %v1272_v46 = vpop.permute.xlu1 %1271 }
 0x777   :  { %v1276_v47 = vsel %vm370_vm2, %v4217_v62, %v1272_v46  ;;  %v1414_v62 = vld [vmem:[%s4644_s4 + $0x8] sm:$0xff] }
 0x778   :  { %3733 = vmatmul.mubr.msk.f32.vlgmr.msra.gmra.mxu0 %vm30_vm0, %v1276_v47 }
 0x779   :  { %3747 = vmatpush3.msra.mxu0 %v1528_v27 }
 0x77a   :  { %3748 = vmatprep.subr.mxu0 %v1527_v28 }
 0x77b   :  { %3749 = vmatpush3.msra.mxu0 %v1527_v28 }
 0x77c   :  { %3750 = vmatprep.subr.mxu0 %v1526_v29 }
 0x77d   :  { %3751 = vmatpush3.msra.mxu0 %v1526_v29 }
 0x77e   :  { %3752 = vmatprep.subr.mxu0 %v1525_v31 }
 0x77f   :  { %3753 = vmatpush3.msra.mxu0 %v1525_v31 }
 0x780   :  { %3754 = vmatprep.subr.mxu0 %v1524_v32 }
 0x781   :  { %3755 = vmatpush3.msra.mxu0 %v1524_v32 }
 0x782   :  { %3756 = vmatprep.subr.mxu0 %v1523_v33 }
 0x783   :  { %3757 = vmatpush3.msra.mxu0 %v1523_v33 }
 0x784   :  { %3758 = vmatprep.subr.mxu0 %v1522_v34 }
 0x785   :  { %3759 = vmatpush3.msra.mxu0 %v1522_v34  ;;  %v3377_v34 = vld [vmem:[%s4641_s6 + $0x2e] ss:$0 sm:$0xff] }
 0x786   :  { %3760 = vmatprep.subr.mxu0 %v1521_v35 }
 0x787   :  { %3761 = vmatpush3.msra.mxu0 %v1521_v35 }
 0x838   :  { %v3734_v49 = vpop.f32.mrf.mxu0 }
 0x839   :  { %v1364_v50 = vadd.f32 %v3734_v49, %v3366_v48 }
 0x83a   :  { %v1358_v51 = vpop.f32.mrf.mxu0 }
 0x83b   :  { %v1368_v52 = vadd.f32 %v1364_v50, %v4090_v42  ;;  %v1359_v53 = vadd.f32 %v3366_v48, %v1358_v51  ;;  %v1416_v42 = vld [vmem:[%s4644_s4 + $0x18] sm:$0xff] }
 0x83c   :  { %3735 = vmatprep.subr.mxu1 %v1416_v42 }
 0x83d   :  { %v1367_v55 = vadd.f32 %v1359_v53, %v4083_v38  ;;  %v1374_v56 = vsel %vm30_vm0, %v1368_v52, 0.0  ;;  %v1380_v59 = vmul.f32 %v1368_v52, %v1368_v52  ;;  %v1415_v38 = vld [vmem:[%s4644_s4 + $0x10] sm:$0xff]  ;;  %3736 = vmatpush3.msra.mxu1 %v1416_v42  ;;  %v3374_v42 = vld [vmem:[%s4641_s6 + $0x2d] ss:$0 sm:$0xff] }
 0x83e   :  { %1375 = vadd.xlane.f32.xlu0 %v1374_v56  ;;  %3737 = vmatprep.subr.mxu1 %v1415_v38 }
 0x83f   :  { %v1371_v57 = vsel %vm30_vm0, %v1367_v55, 0.0  ;;  %v1379_v58 = vmul.f32 %v1367_v55, %v1367_v55  ;;  %v1384_v61 = vsel %vm30_vm0, %v1380_v59, 0.0  ;;  %3738 = vmatpush3.msra.mxu1 %v1415_v38 }
 0x840   :  { %1372 = vadd.xlane.f32.xlu1 %v1371_v57  ;;  %3739 = vmatprep.subr.mxu1 %v1414_v62 }
 0x841   :  { %v1381_v60 = vsel %vm30_vm0, %v1379_v58, 0.0  ;;  %3740 = vmatpush3.msra.mxu1 %v1414_v62 }
 0x842   :  { %1382 = vadd.xlane.f32.xlu0 %v1381_v60  ;;  %3741 = vmatprep.subr.mxu1 %v1413_v63 }
 0x843   :  { %3742 = vmatpush3.msra.mxu1 %v1413_v63 }
 0x844   :  { %1385 = vadd.xlane.f32.xlu1 %v1384_v61 }
 0x8c7   :  { %v1376_v0 = vpop.xlane.xlu0 %1375 }
 0x8c8   :  { %v1378_v2 = vmul.f32 0.03125, %v1376_v0 }
 0x8c9   :  { %v1373_v1 = vpop.xlane.xlu1 %1372 }
 0x8ca   :  { %v1377_v3 = vmul.f32 0.03125, %v1373_v1  ;;  %v1390_v7 = vmul.f32 %v1378_v2, %v1378_v2  ;;  %v1394_v20 = vsub.f32 %v1368_v52, %v1378_v2 }
 0x8cb   :  { %v1383_v4 = vpop.xlane.xlu0 %1382 }
 0x8cc   :  { %v1389_v5 = vmul.f32 %v1377_v3, %v1377_v3  ;;  %v1387_v8 = vmul.f32 0.03125, %v1383_v4  ;;  %v1393_v17 = vsub.f32 %v1367_v55, %v1377_v3 }
 0x8cd   :  { %v1386_v9 = vpop.xlane.xlu1 %1385 }
 0x8ce   :  { %v1391_v11 = vsub.f32 %v1387_v8, %v1389_v5  ;;  %v1388_v12 = vmul.f32 0.03125, %v1386_v9 }
 0x8d0   :  { %v1395_v13 = vadd.f32 1e-12, %v1391_v11  ;;  %v1392_v14 = vsub.f32 %v1388_v12, %v1390_v7  ;;  %v3382_v11 = vld [vmem:[%s4640_s2 + $0xd8] sm:$0xff] }
 0x8d1   :  { %3765 = vmatprep.subr.mxu1 %v3382_v11  ;;  %v3396_v12 = vld [vmem:[%s4640_s2 + $0x158] sm:$0xff] }
 0x8d2   :  { %3947 = vrsqrt.f32 %v1395_v13  ;;  %v1396_v15 = vadd.f32 1e-12, %v1392_v14  ;;  %3787 = vmatprep.subr.mxu0 %v3396_v12  ;;  %v3381_v13 = vld [vmem:[%s4640_s2 + $0xd0] sm:$0xff] }
 0x8d3   :  { %v3395_v14 = vld [vmem:[%s4640_s2 + $0x150] sm:$0xff] }
 0x8d4   :  { %3949 = vrsqrt.f32 %v1396_v15  ;;  %v3380_v15 = vld [vmem:[%s4640_s2 + $0xc8] sm:$0xff] }
 0x8df   :  { %v3948_v16 = vpop.eup %3947 }
 0x8e0   :  { %v1403_v18 = vmul.f32 %v3948_v16, %v3369_v6  ;;  %v3379_v16 = vld [vmem:[%s4640_s2 + $0xc0] sm:$0xff] }
 0x8e1   :  { %v3950_v10 = vpop.eup %3949 }
 0x8e2   :  { %v1404_v21 = vmul.f32 %v3950_v10, %v3369_v6  ;;  %v1405_v22 = vmul.f32 %v1403_v18, %v1393_v17  ;;  %v3394_v6 = vld [vmem:[%s4640_s2 + $0x148] sm:$0xff]  ;;  %v3393_v17 = vld [vmem:[%s4640_s2 + $0x140] sm:$0xff]  ;;  %v3389_v18 = vld [vmem:[%s4640_s2 + $0x118] sm:$0xff] }
 0x8e4   :  { %v1406_v23 = vmul.f32 %v1404_v21, %v1394_v20  ;;  %v4293_v24 = vadd.f32 %v3370_v19, %v1405_v22 }
 0x8e6   :  { %v1412_v25 = vadd.f32 %v3370_v19, %v1406_v23  ;;  %3743 = vmatprep.mubr.msk.f32.mxu1 %vm30_vm0, %v4293_v24 }
 0x8e8   :  { %3744 = vmatmul.mubr.msk.f32.vlgmr.msra.gmra.mxu1 %vm30_vm0, %v1412_v25 }
 0x8e9   :  { %3766 = vmatpush3.msra.mxu1 %v3382_v11 }
 0x8ea   :  { %3767 = vmatprep.subr.mxu1 %v3381_v13 }
 0x8eb   :  { %3768 = vmatpush3.msra.mxu1 %v3381_v13 }
 0x8ec   :  { %3769 = vmatprep.subr.mxu1 %v3380_v15 }
 0x8ed   :  { %3770 = vmatpush3.msra.mxu1 %v3380_v15 }
 0x8ee   :  { %3771 = vmatprep.subr.mxu1 %v3379_v16 }
 0x8ef   :  { %3772 = vmatpush3.msra.mxu1 %v3379_v16 }
 0x8f0   :  { %3776 = vmatprep.subr.mxu1 %v3389_v18 }
 0x9a8   :  { %v3745_v37 = vpop.f32.mrf.mxu1 }
 0x9a9   :  { %v1500_v39 = vadd.f32 %v3745_v37, %v3371_v36 }
 0x9aa   :  { %v1494_v40 = vpop.f32.mrf.mxu1 }
 0x9ab   :  { %v1504_v41 = vmul.f32 %v1500_v39, %v1500_v39  ;;  %v1495_v43 = vadd.f32 %v3371_v36, %v1494_v40 }
 0x9ad   :  { %v1506_v44 = vmul.f32 %v1504_v41, %v1500_v39  ;;  %v1503_v45 = vmul.f32 %v1495_v43, %v1495_v43 }
 0x9af   :  { %v1508_v46 = vmul.f32 0.044715, %v1506_v44  ;;  %v1505_v47 = vmul.f32 %v1503_v45, %v1495_v43  ;;  %v3378_v44 = vld [vmem:[%s4641_s6 + $0x2f] ss:$0 sm:$0xff] }
 0x9b1   :  { %v1510_v48 = vadd.f32 %v1508_v46, %v1500_v39  ;;  %v1507_v49 = vmul.f32 0.044715, %v1505_v47 }
 0x9b3   :  { %v1512_v50 = vmul.f32 0.7978846, %v1510_v48  ;;  %v1509_v51 = vadd.f32 %v1507_v49, %v1495_v43  ;;  %v3388_v48 = vld [vmem:[%s4640_s2 + $0x110] sm:$0xff]  ;;  %v3387_v49 = vld [vmem:[%s4640_s2 + $0x108] sm:$0xff] }
 0x9b5   :  { %3951 = vtanh.f32 %v1512_v50  ;;  %v1511_v52 = vmul.f32 0.7978846, %v1509_v51  ;;  %v3386_v50 = vld [vmem:[%s4640_s2 + $0x100] sm:$0xff] }
 0x9b7   :  { %3953 = vtanh.f32 %v1511_v52 }
 0x9c2   :  { %v3952_v53 = vpop.eup %3951 }
 0x9c3   :  { %v1516_v55 = vadd.f32 1.0, %v3952_v53  ;;  %v3397_v53 = vld [vmem:[%s4641_s6 + $0x34] ss:$0 sm:$0xff] }
 0x9c4   :  { %v3954_v56 = vpop.eup %3953 }
 0x9c5   :  { %v1515_v57 = vadd.f32 1.0, %v3954_v56  ;;  %v1518_v58 = vmul.f32 0.5, %v1516_v55 }
 0x9c7   :  { %v1517_v59 = vmul.f32 0.5, %v1515_v57  ;;  %v1520_v61 = vmul.f32 %v1518_v58, %v1500_v39 }
 0x9c9   :  { %v1519_v60 = vmul.f32 %v1517_v59, %v1495_v43  ;;  %v3390_v59 = vld [vmem:[%s4641_s6 + $0x32] ss:$0 sm:$0xff] }
 0x9cb   :  { %3762 = vmatprep.mubr.msk.f32.mxu0 %vm1534_vm4, %v1519_v60 }
 0x9cc   :  { %3763 = vmatmul.mubr.msk.f32.vlgmr.msra.gmra.mxu0 %vm1534_vm4, %v1520_v61 }
 0x9cd   :  { %3788 = vmatpush3.msra.mxu0 %v3396_v12 }
 0x9ce   :  { %3789 = vmatprep.subr.mxu0 %v3395_v14 }
 0x9cf   :  { %3790 = vmatpush3.msra.mxu0 %v3395_v14 }
 0x9d0   :  { %3791 = vmatprep.subr.mxu0 %v3394_v6 }
 0x9d1   :  { %3792 = vmatpush3.msra.mxu0 %v3394_v6 }
 0x9d2   :  { %3793 = vmatprep.subr.mxu0 %v3393_v17 }
 0x9d3   :  { %3794 = vmatpush3.msra.mxu0 %v3393_v17 }
 0x9d4   :  { %3808 = vmatprep.subr.mxu0 %v3991_v54 }
 0xa8c   :  { %v3764_v38 = vpop.f32.mrf.mxu0 }
 0xa8d   :  { %v1613_v62 = vadd.f32 %v3764_v38, %v3374_v42 }
 0xa8e   :  { %v1607_v63 = vpop.f32.mrf.mxu0 }
 0xa8f   :  { %v4330_v0 = vadd.f32 %v1613_v62, %v1412_v25  ;;  %v1608_v1 = vadd.f32 %v3374_v42, %v1607_v63  ;;  %v3383_v42 = vld [vmem:[%s4641_s6 + $0x30] ss:$0 sm:$0xff] }
 0xa91   :  { %v4333_v2 = vadd.f32 %v1608_v1, %v4293_v24  ;;  %v1623_v3 = vsel %vm30_vm0, %v4330_v0, 0.0  ;;  %v1629_v4 = vmul.f32 %v4330_v0, %v4330_v0 }
 0xa92   :  { %1624 = vadd.xlane.f32.xlu1 %v1623_v3 }
 0xa93   :  { %v1620_v5 = vsel %vm30_vm0, %v4333_v2, 0.0  ;;  %v1628_v8 = vmul.f32 %v4333_v2, %v4333_v2  ;;  %v1633_v9 = vsel %vm30_vm0, %v1629_v4, 0.0 }
 0xa94   :  { %1621 = vadd.xlane.f32.xlu0 %v1620_v5 }
 0xa95   :  { %v1630_v7 = vsel %vm30_vm0, %v1628_v8, 0.0 }
 0xa96   :  { %1634 = vadd.xlane.f32.xlu1 %v1633_v9 }
 0xa98   :  { %1631 = vadd.xlane.f32.xlu0 %v1630_v7 }
 0xb1b   :  { %v1625_v10 = vpop.xlane.xlu1 %1624 }
 0xb1c   :  { %v1627_v19 = vmul.f32 0.03125, %v1625_v10 }
 0xb1d   :  { %v1622_v20 = vpop.xlane.xlu0 %1621 }
 0xb1e   :  { %v1626_v21 = vmul.f32 0.03125, %v1622_v20  ;;  %v1639_v23 = vmul.f32 %v1627_v19, %v1627_v19  ;;  %v1643_v39 = vsub.f32 %v4330_v0, %v1627_v19  ;;  %v3409_v19 = vld [vmem:[%s4640_s2 + $0xf8] sm:$0xff] }
 0xb1f   :  { %v1635_v22 = vpop.xlane.xlu1 %1634  ;;  %v3416_v20 = vld [vmem:[%s4640_s2 + $0x138] sm:$0xff] }
 0xb20   :  { %v1637_v24 = vmul.f32 0.03125, %v1635_v22  ;;  %v1638_v27 = vmul.f32 %v1626_v21, %v1626_v21  ;;  %v1642_v40 = vsub.f32 %v4333_v2, %v1626_v21 }
 0xb21   :  { %v1632_v25 = vpop.xlane.xlu0 %1631 }
 0xb22   :  { %v1641_v28 = vsub.f32 %v1637_v24, %v1639_v23  ;;  %v1636_v29 = vmul.f32 0.03125, %v1632_v25  ;;  %v3408_v25 = vld [vmem:[%s4640_s2 + $0xf0] sm:$0xff] }
 0xb24   :  { %v1645_v31 = vadd.f32 1e-12, %v1641_v28  ;;  %v1640_v32 = vsub.f32 %v1636_v29, %v1638_v27  ;;  %v3407_v28 = vld [vmem:[%s4640_s2 + $0xe8] sm:$0xff] }
 0xb26   :  { %3955 = vrsqrt.f32 %v1645_v31  ;;  %v1644_v33 = vadd.f32 1e-12, %v1640_v32  ;;  %v3406_v31 = vld [vmem:[%s4640_s2 + $0xe0] sm:$0xff]  ;;  %v3415_v32 = vld [vmem:[%s4640_s2 + $0x130] sm:$0xff] }
 0xb28   :  { %3957 = vrsqrt.f32 %v1644_v33  ;;  %v3414_v33 = vld [vmem:[%s4640_s2 + $0x128] sm:$0xff] }
 0xb33   :  { %v3956_v35 = vpop.eup %3955 }
 0xb34   :  { %v1653_v36 = vmul.f32 %v3956_v35, %v3377_v34  ;;  %v3413_v35 = vld [vmem:[%s4640_s2 + $0x120] sm:$0xff] }
 0xb35   :  { %v3958_v37 = vpop.eup %3957 }
 0xb36   :  { %v1652_v41 = vmul.f32 %v3958_v37, %v3377_v34  ;;  %v1655_v43 = vmul.f32 %v1653_v36, %v1643_v39  ;;  %v3423_v34 = vld [vmem:[%s4640_s2 + $0x178] sm:$0xff]  ;;  %v3422_v36 = vld [vmem:[%s4640_s2 + $0x170] sm:$0xff]  ;;  %v3421_v37 = vld [vmem:[%s4640_s2 + $0x168] sm:$0xff] }
 0xb37   :  { %v3420_v39 = vld [vmem:[%s4640_s2 + $0x160] sm:$0xff] }
 0xb38   :  { %v1654_v45 = vmul.f32 %v1652_v41, %v1642_v40  ;;  %v4383_v47 = vadd.f32 %v3378_v44, %v1655_v43 }
 0xb3a   :  { %v4381_v46 = vadd.f32 %v3378_v44, %v1654_v45 }
 0xb3c   :  { %3773 = vmatprep.mubr.msk.f32.mxu1 %vm30_vm0, %v4381_v46  ;;  %3795 = vmatprep.mubr.msk.f32.mxu0 %vm30_vm0, %v4381_v46 }
 0xb3d   :  { %3774 = vmatmul.mubr.msk.f32.vlgmr.msra.gmra.mxu1 %vm30_vm0, %v4383_v47  ;;  %3796 = vmatmul.mubr.msk.f32.vlgmr.msra.gmra.mxu0 %vm30_vm0, %v4383_v47 }
 0xb3e   :  { %3777 = vmatpush3.msra.mxu1 %v3389_v18  ;;  %3784 = vmatprep.mubr.msk.f32.mxu1 %vm30_vm0, %v4381_v46 }
 0xb3f   :  { %3778 = vmatprep.subr.mxu1 %v3388_v48  ;;  %3810 = vmatprep.mubr.msk.f32.mxu0 %vm3992_vm1, %v3991_v54 }
 0xb40   :  { %3779 = vmatpush3.msra.mxu1 %v3388_v48 }
 0xb41   :  { %3780 = vmatprep.subr.mxu1 %v3387_v49 }
 0xb42   :  { %3781 = vmatpush3.msra.mxu1 %v3387_v49  ;;  %v3417_v49 = vld [vmem:[%s4641_s6 + $0x33] ss:$0 sm:$0xff] }
 0xb43   :  { %3782 = vmatprep.subr.mxu1 %v3386_v50 }
 0xb44   :  { %3783 = vmatpush3.msra.mxu1 %v3386_v50 }
 0xb45   :  { %3785 = vmatmul.mubr.msk.f32.vlgmr.msra.gmra.mxu1 %vm30_vm0, %v4383_v47  ;;  %3798 = vmatprep.subr.mxu1 %v3991_v54 }
 0xb46   :  { %3800 = vmatprep.mubr.msk.f32.mxu1 %vm3992_vm1, %v3991_v54 }
 0xbfd   :  { %v3797_v51 = vpop.f32.mrf.mxu0  ;;  %v3775_v52 = vpop.f32.mrf.mxu1 }
 0xbfe   :  { %v1750_v63 = vadd.f32 %v3775_v52, %v3383_v42  ;;  %v1920_v0 = vadd.f32 %v3797_v51, %v3397_v53 }
 0xbff   :  { %v1914_v55 = vpop.f32.mrf.mxu0  ;;  %v1744_v57 = vpop.f32.mrf.mxu1 }
 0xc00   :  { %v1915_v56 = vadd.f32 %v3397_v53, %v1914_v55  ;;  %v1745_v38 = vadd.f32 %v3383_v42, %v1744_v57  ;;  %v3410_v53 = vld [vmem:[%s4641_s6 + $0x31] ss:$0 sm:$0xff] }
 0xc02   :  { %3809 = vmatpush3.msra.mxu0 %v1915_v56 }
 0xc03   :  { %3818 = vmatprep.subr.mxu0 %v3409_v19 }
 0xc05   :  { %v3786_v58 = vpop.f32.mrf.mxu1 }
 0xc06   :  { %v1835_v62 = vadd.f32 %v3786_v58, %v3390_v59  ;;  %v3424_v58 = vld [vmem:[%s4641_s6 + $0x35] ss:$0 sm:$0xff] }
 0xc07   :  { %v1829_v60 = vpop.f32.mrf.mxu1 }
 0xc08   :  { %v1830_v61 = vadd.f32 %v3390_v59, %v1829_v60 }
 0xc0a   :  { %3799 = vmatpush3.xpose.msk.msra.mxu1 %vm370_vm2, %v1830_v61 }
 0xc0b   :  { %3803 = vmatprep.subr.mxu1 %v3991_v54 }
 0xc0d   :  { %3801 = vmatmul.mubr.msk.f32.vlgmr.msra.gmra.mxu1 %vm370_vm2, %v1745_v38 }
 0xc0e   :  { %3804 = vmatpush3.xpose.msk.msra.mxu1 %vm370_vm2, %v1835_v62  ;;  %3805 = vmatprep.mubr.msk.f32.mxu1 %vm3992_vm1, %v3991_v54 }
 0xc0f   :  { %3813 = vmatprep.subr.mxu1 %v3991_v54 }
 0xc11   :  { %3806 = vmatmul.mubr.msk.f32.vlgmr.msra.gmra.mxu1 %vm370_vm2, %v1750_v63 }
 0xc12   :  { %3814 = vmatpush3.msra.mxu1 %v1920_v0  ;;  %3815 = vmatprep.mubr.msk.f32.mxu1 %vm3992_vm1, %v3991_v54 }
 0xc13   :  { %3829 = vmatprep.subr.mxu1 %v3416_v20 }
 0xccd   :  { %v1995_v1 = vpop.f32.mrf.mxu1 }
 0xcce   :  { %v1996_v2 = vadd.f32 %v1995_v1, %v4181_v26 }
 0xccf   :  { %v3802_v3 = vpop.f32.mrf.mxu1 }
 0xcd0   :  { %v2075_v4 = vsel %vm523_vm3, %v1996_v2, -inf }
 0xcd1   :  { %2076 = vmax.xlane.f32.xlu1 %v2075_v4  ;;  %v2071_v5 = vpop.f32.mrf.mxu1 }
 0xcd2   :  { %v2072_v8 = vadd.f32 %v2071_v5, %v4184_v30 }
 0xcd3   :  { %v3807_v9 = vpop.f32.mrf.mxu1 }
 0xcd4   :  { %v2078_v7 = vsel %vm523_vm3, %v2072_v8, -inf }
 0xcd5   :  { %2079 = vmax.xlane.f32.xlu0 %v2078_v7 }
 0xd5a   :  { %v2077_v11 = vpop.xlane.xlu1 %2076 }
 0xd5b   :  { %v2081_v12 = vsub.f32 %v1996_v2, %v2077_v11 }
 0xd5d   :  { %v2083_v13 = vmul.f32 1.442695, %v2081_v12 }
 0xd5e   :  { %v2080_v14 = vpop.xlane.xlu0 %2079 }
 0xd5f   :  { %3959 = vpow2.f32 %v2083_v13  ;;  %v2082_v15 = vsub.f32 %v2072_v8, %v2080_v14 }
 0xd61   :  { %v2085_v6 = vmul.f32 1.442695, %v2082_v15 }
 0xd63   :  { %3961 = vpow2.f32 %v2085_v6 }
 0xd6c   :  { %v3960_v16 = vpop.eup %3959 }
 0xd6d   :  { %v2087_v17 = vsel %vm523_vm3, %v3960_v16, 0.0 }
 0xd6e   :  { %2088 = vadd.xlane.f32.xlu1 %v2087_v17 }
 0xd70   :  { %v3962_v18 = vpop.eup %3961 }
 0xd71   :  { %v2090_v10 = vsel %vm523_vm3, %v3962_v18, 0.0 }
 0xd72   :  { %2091 = vadd.xlane.f32.xlu0 %v2090_v10 }
 0xdf7   :  { %v2089_v21 = vpop.xlane.xlu1 %2088 }
 0xdf8   :  { %3963 = vrcp.f32 %v2089_v21  ;;  %v3434_v21 = vld [vmem:[%s4643_s3 + $0x28] sm:$0xff] }
 0xdfb   :  { %v2092_v22 = vpop.xlane.xlu0 %2091 }
 0xdfc   :  { %3965 = vrcp.f32 %v2092_v22  ;;  %v3433_v22 = vld [vmem:[%s4643_s3 + $0x20] sm:$0xff] }
 0xe05   :  { %v3964_v23 = vpop.eup %3963 }
 0xe06   :  { %v2095_v24 = vmul.f32 %v3964_v23, %v3960_v16 }
 0xe08   :  { %3811 = vmatmul.mubr.msk.f32.vlgmr.msra.gmra.mxu0 %vm523_vm3, %v2095_v24 }
 0xe09   :  { %v3966_v27 = vpop.eup %3965  ;;  %3819 = vmatpush3.msra.mxu0 %v3409_v19  ;;  %3826 = vmatprep.mubr.msk.f32.mxu0 %vm30_vm0, %v4381_v46  ;;  %v3436_v19 = vld [vmem:[%s4643_s3 + $0x38] sm:$0xff] }
 0xe0a   :  { %3820 = vmatprep.subr.mxu0 %v3408_v25  ;;  %v2096_v29 = vmul.f32 %v3966_v27, %v3962_v18 }
 0xe0b   :  { %3821 = vmatpush3.msra.mxu0 %v3408_v25 }
 0xe0c   :  { %3822 = vmatprep.subr.mxu0 %v3407_v28  ;;  %3816 = vmatmul.mubr.msk.f32.vlgmr.msra.gmra.mxu1 %vm523_vm3, %v2096_v29 }
 0xe0d   :  { %3823 = vmatpush3.msra.mxu0 %v3407_v28  ;;  %3830 = vmatpush3.msra.mxu1 %v3416_v20  ;;  %v3435_v20 = vld [vmem:[%s4643_s3 + $0x30] sm:$0xff] }
 0xe0e   :  { %3824 = vmatprep.subr.mxu0 %v3406_v31  ;;  %3831 = vmatprep.subr.mxu1 %v3415_v32 }
 0xe0f   :  { %3837 = vmatprep.mubr.msk.f32.mxu1 %vm30_vm0, %v4381_v46  ;;  %3825 = vmatpush3.msra.mxu0 %v3406_v31 }
 0xe10   :  { %3832 = vmatpush3.msra.mxu1 %v3415_v32  ;;  %3827 = vmatmul.mubr.msk.f32.vlgmr.msra.gmra.mxu0 %vm30_vm0, %v4383_v47 }
 0xe11   :  { %3833 = vmatprep.subr.mxu1 %v3414_v33  ;;  %3840 = vmatprep.subr.mxu0 %v3423_v34 }
 0xe12   :  { %3834 = vmatpush3.msra.mxu1 %v3414_v33  ;;  %3841 = vmatpush3.msra.mxu0 %v3423_v34  ;;  %v3437_v33 = vld [vmem:[%s4641_s6 + $0x36] ss:$0 sm:$0xff] }
 0xe13   :  { %3848 = vmatprep.mubr.msk.f32.mxu0 %vm30_vm0, %v4381_v46  ;;  %3835 = vmatprep.subr.mxu1 %v3413_v35 }
 0xe14   :  { %3842 = vmatprep.subr.mxu0 %v3422_v36  ;;  %3836 = vmatpush3.msra.mxu1 %v3413_v35 }
 0xe15   :  { %3843 = vmatpush3.msra.mxu0 %v3422_v36  ;;  %3838 = vmatmul.mubr.msk.f32.vlgmr.msra.gmra.mxu1 %vm30_vm0, %v4383_v47 }
 0xe16   :  { %3844 = vmatprep.subr.mxu0 %v3421_v37  ;;  %3851 = vmatprep.subr.mxu1 %v3991_v54 }
 0xe17   :  { %3845 = vmatpush3.msra.mxu0 %v3421_v37  ;;  %3853 = vmatprep.mubr.msk.f32.mxu1 %vm3992_vm1, %v3991_v54 }
 0xe18   :  { %3846 = vmatprep.subr.mxu0 %v3420_v39 }
 0xe19   :  { %3847 = vmatpush3.msra.mxu0 %v3420_v39 }
 0xe1a   :  { %3849 = vmatmul.mubr.msk.f32.vlgmr.msra.gmra.mxu0 %vm30_vm0, %v4383_v47  ;;  %3861 = vmatprep.subr.mxu0 %v3991_v54 }
 0xe1b   :  { %3863 = vmatprep.mubr.msk.f32.mxu0 %vm3992_vm1, %v3991_v54 }
 0xec8   :  { %v4492_v40 = vpop.f32.mrf.mxu0 }
 0xeca   :  { %v3812_v41 = vpop.f32.mrf.mxu0 }
 0xecc   :  { %v4494_v43 = vpop.f32.mrf.mxu1 }
 0xece   :  { %v3817_v44 = vpop.f32.mrf.mxu1 }
 0xed0   :  { %v3828_v45 = vpop.f32.mrf.mxu0 }
 0xed1   :  { %v2325_v61 = vadd.f32 %v3828_v45, %v3410_v53 }
 0xed2   :  { %v2319_v51 = vpop.f32.mrf.mxu0 }
 0xed3   :  { %v2320_v56 = vadd.f32 %v3410_v53, %v2319_v51  ;;  %v3442_v51 = vld [vmem:[%s4644_s4 + $0x20] sm:$0xff] }
 0xed5   :  { %v3839_v48 = vpop.f32.mrf.mxu1 }
 0xed6   :  { %v2410_v57 = vadd.f32 %v3839_v48, %v3417_v49 }
 0xed7   :  { %v2404_v50 = vpop.f32.mrf.mxu1 }
 0xed8   :  { %v2405_v52 = vadd.f32 %v3417_v49, %v2404_v50  ;;  %v3443_v50 = vld [vmem:[%s4644_s4 + $0x28] sm:$0xff] }
 0xeda   :  { %v3850_v55 = vpop.f32.mrf.mxu0  ;;  %3852 = vmatpush3.xpose.msk.msra.mxu1 %vm370_vm2, %v2405_v52 }
 0xedb   :  { %3856 = vmatprep.subr.mxu1 %v3991_v54  ;;  %v2495_v42 = vadd.f32 %v3850_v55, %v3424_v58 }
 0xedc   :  { %v2489_v59 = vpop.f32.mrf.mxu0 }
 0xedd   :  { %v2490_v60 = vadd.f32 %v3424_v58, %v2489_v59  ;;  %3854 = vmatmul.mubr.msk.f32.vlgmr.msra.gmra.mxu1 %vm370_vm2, %v2320_v56 }
 0xede   :  { %3857 = vmatpush3.xpose.msk.msra.mxu1 %vm370_vm2, %v2410_v57  ;;  %3858 = vmatprep.mubr.msk.f32.mxu1 %vm3992_vm1, %v3991_v54 }
 0xedf   :  { %3862 = vmatpush3.msra.mxu0 %v2490_v60  ;;  %3866 = vmatprep.subr.mxu1 %v3991_v54 }
 0xee0   :  { %3871 = vmatprep.subr.mxu0 %v3436_v19 }
 0xee1   :  { %3859 = vmatmul.mubr.msk.f32.vlgmr.msra.gmra.mxu1 %vm370_vm2, %v2325_v61 }
 0xee2   :  { %3867 = vmatpush3.msra.mxu1 %v2495_v42  ;;  %3868 = vmatprep.mubr.msk.f32.mxu1 %vm3992_vm1, %v3991_v54 }
 0xf9d   :  { %v2570_v38 = vpop.f32.mrf.mxu1 }
 0xf9e   :  { %v2571_v62 = vadd.f32 %v2570_v38, %v4181_v26 }
 0xf9f   :  { %v3855_v63 = vpop.f32.mrf.mxu1 }
 0xfa0   :  { %v2650_v0 = vsel %vm523_vm3, %v2571_v62, -inf }
 0xfa1   :  { %2651 = vmax.xlane.f32.xlu0 %v2650_v0  ;;  %v2646_v1 = vpop.f32.mrf.mxu1 }
 0xfa2   :  { %v2647_v2 = vadd.f32 %v2646_v1, %v4184_v30  ;;  %v3440_v1 = vld [vmem:[%s4641_s6 + $0x37] ss:$0 sm:$0xff] }
 0xfa3   :  { %v3860_v3 = vpop.f32.mrf.mxu1 }
 0xfa4   :  { %v2653_v4 = vsel %vm523_vm3, %v2647_v2, -inf }
 0xfa5   :  { %2654 = vmax.xlane.f32.xlu1 %v2653_v4 }
0x102a   :  { %v2652_v5 = vpop.xlane.xlu0 %2651 }
0x102b   :  { %v2656_v8 = vsub.f32 %v2571_v62, %v2652_v5 }
0x102d   :  { %v2658_v9 = vmul.f32 1.442695, %v2656_v8  ;;  %v3441_v8 = vld [vmem:[%s4641_s6 + $0x38] ss:$0 sm:$0xff] }
0x102e   :  { %v2655_v7 = vpop.xlane.xlu1 %2654 }
0x102f   :  { %3967 = vpow2.f32 %v2658_v9  ;;  %v2657_v11 = vsub.f32 %v2647_v2, %v2655_v7 }
0x1031   :  { %v2660_v12 = vmul.f32 1.442695, %v2657_v11 }
0x1033   :  { %3969 = vpow2.f32 %v2660_v12 }
0x103c   :  { %v3968_v26 = vpop.eup %3967 }
0x103d   :  { %v2662_v13 = vsel %vm523_vm3, %v3968_v26, 0.0 }
0x103e   :  { %2663 = vadd.xlane.f32.xlu0 %v2662_v13 }
0x1040   :  { %v3970_v14 = vpop.eup %3969 }
0x1041   :  { %v2665_v15 = vsel %vm523_vm3, %v3970_v14, 0.0 }
0x1042   :  { %2666 = vadd.xlane.f32.xlu1 %v2665_v15  ;;  %v3455_v15 = vld [vmem:[%s4645_s5 + $0x70] sm:$0xff] }
0x10c7   :  { %v2664_v30 = vpop.xlane.xlu0 %2663 }
0x10c8   :  { %3971 = vrcp.f32 %v2664_v30  ;;  %v3454_v30 = vld [vmem:[%s4645_s5 + $0x68] sm:$0xff] }
0x10cb   :  { %v2667_v6 = vpop.xlane.xlu1 %2666 }
0x10cc   :  { %3973 = vrcp.f32 %v2667_v6  ;;  %v3453_v6 = vld [vmem:[%s4645_s5 + $0x60] sm:$0xff] }
0x10d5   :  { %v3972_v16 = vpop.eup %3971 }
0x10d6   :  { %v2670_v17 = vmul.f32 %v3972_v16, %v3968_v26  ;;  %v3452_v16 = vld [vmem:[%s4645_s5 + $0x58] sm:$0xff] }
0x10d8   :  { %3864 = vmatmul.mubr.msk.f32.vlgmr.msra.gmra.mxu0 %vm523_vm3, %v2670_v17  ;;  %v3451_v17 = vld [vmem:[%s4645_s5 + $0x50] sm:$0xff] }
0x10d9   :  { %v3974_v18 = vpop.eup %3973  ;;  %3872 = vmatpush3.msra.mxu0 %v3436_v19  ;;  %v3446_v19 = vld [vmem:[%s4641_s6 + $0x39] ss:$0 sm:$0xff] }
0x10da   :  { %v2671_v10 = vmul.f32 %v3974_v18, %v3970_v14  ;;  %3873 = vmatprep.subr.mxu0 %v3435_v20  ;;  %v3456_v14 = vld [vmem:[%s4645_s5 + $0x78] sm:$0xff]  ;;  %v3450_v18 = vld [vmem:[%s4645_s5 + $0x48] sm:$0xff] }
0x10db   :  { %3874 = vmatpush3.msra.mxu0 %v3435_v20 }
0x10dc   :  { %3869 = vmatmul.mubr.msk.f32.vlgmr.msra.gmra.mxu1 %vm523_vm3, %v2671_v10  ;;  %3875 = vmatprep.subr.mxu0 %v3434_v21  ;;  %v3449_v10 = vld [vmem:[%s4645_s5 + $0x40] sm:$0xff] }
0x10dd   :  { %3876 = vmatpush3.msra.mxu0 %v3434_v21 }
0x10de   :  { %3877 = vmatprep.subr.mxu0 %v3433_v22 }
0x10df   :  { %3878 = vmatpush3.msra.mxu0 %v3433_v22 }
0x10e0   :  { %3893 = vmatprep.subr.mxu0 %v3456_v14 }
0x1198   :  { %v2741_v23 = vpop.f32.mrf.mxu0 }
0x1199   :  { %2820 = vrot.lane.b32.xlu0 %v2741_v23, %s3994_s0 }
0x119a   :  { %v3865_v24 = vpop.f32.mrf.mxu0 }
0x119c   :  { %v2814_v25 = vpop.f32.mrf.mxu1 }
0x119d   :  { %2822 = vrot.lane.b32.xlu1 %v2814_v25, %s3994_s0 }
0x119e   :  { %v3870_v27 = vpop.f32.mrf.mxu1 }
0x120b   :  { %v2821_v28 = vpop.permute.xlu0 %2820 }
0x120c   :  { %v2826_v29 = vsel %vm370_vm2, %v4492_v40, %v2821_v28 }
0x120d   :  { %3879 = vmatprep.mubr.msk.f32.mxu0 %vm30_vm0, %v2826_v29 }
0x120f   :  { %v2823_v31 = vpop.permute.xlu1 %2822 }
0x1210   :  { %v2827_v32 = vsel %vm370_vm2, %v4494_v43, %v2823_v31 }
0x1211   :  { %3880 = vmatmul.mubr.msk.f32.vlgmr.msra.gmra.mxu0 %vm30_vm0, %v2827_v32 }
0x1212   :  { %3894 = vmatpush3.msra.mxu0 %v3456_v14 }
0x1213   :  { %3895 = vmatprep.subr.mxu0 %v3455_v15 }
0x1214   :  { %3896 = vmatpush3.msra.mxu0 %v3455_v15 }
0x1215   :  { %3897 = vmatprep.subr.mxu0 %v3454_v30 }
0x1216   :  { %3898 = vmatpush3.msra.mxu0 %v3454_v30 }
0x1217   :  { %3899 = vmatprep.subr.mxu0 %v3453_v6 }
0x1218   :  { %3900 = vmatpush3.msra.mxu0 %v3453_v6  ;;  %v3461_v6 = vld [vmem:[%s4641_s6 + $0x3c] ss:$0 sm:$0xff] }
0x1219   :  { %3901 = vmatprep.subr.mxu0 %v3452_v16 }
0x121a   :  { %3902 = vmatpush3.msra.mxu0 %v3452_v16 }
0x121b   :  { %3903 = vmatprep.subr.mxu0 %v3451_v17 }
0x121c   :  { %3904 = vmatpush3.msra.mxu0 %v3451_v17 }
0x121d   :  { %3905 = vmatprep.subr.mxu0 %v3450_v18 }
0x121e   :  { %3906 = vmatpush3.msra.mxu0 %v3450_v18 }
0x121f   :  { %3907 = vmatprep.subr.mxu0 %v3449_v10 }
0x1220   :  { %3908 = vmatpush3.msra.mxu0 %v3449_v10 }
0x12d1   :  { %v3881_v34 = vpop.f32.mrf.mxu0 }
0x12d2   :  { %v2916_v35 = vadd.f32 %v3881_v34, %v3437_v33 }
0x12d3   :  { %v2910_v36 = vpop.f32.mrf.mxu0 }
0x12d4   :  { %v2920_v37 = vadd.f32 %v2916_v35, %v4383_v47  ;;  %v2911_v39 = vadd.f32 %v3437_v33, %v2910_v36  ;;  %v3445_v47 = vld [vmem:[%s4644_s4 + $0x38] sm:$0xff] }
0x12d5   :  { %3882 = vmatprep.subr.mxu1 %v3445_v47 }
0x12d6   :  { %v2919_v40 = vadd.f32 %v2911_v39, %v4381_v46  ;;  %v2926_v41 = vsel %vm30_vm0, %v2920_v37, 0.0  ;;  %v2932_v45 = vmul.f32 %v2920_v37, %v2920_v37  ;;  %v3444_v46 = vld [vmem:[%s4644_s4 + $0x30] sm:$0xff]  ;;  %3883 = vmatpush3.msra.mxu1 %v3445_v47 }
0x12d7   :  { %2927 = vadd.xlane.f32.xlu0 %v2926_v41  ;;  %3884 = vmatprep.subr.mxu1 %v3444_v46 }
0x12d8   :  { %v2923_v44 = vsel %vm30_vm0, %v2919_v40, 0.0  ;;  %v2931_v43 = vmul.f32 %v2919_v40, %v2919_v40  ;;  %v2936_v49 = vsel %vm30_vm0, %v2932_v45, 0.0  ;;  %3885 = vmatpush3.msra.mxu1 %v3444_v46 }
0x12d9   :  { %2924 = vadd.xlane.f32.xlu1 %v2923_v44  ;;  %3886 = vmatprep.subr.mxu1 %v3443_v50 }
0x12da   :  { %v2933_v48 = vsel %vm30_vm0, %v2931_v43, 0.0  ;;  %3887 = vmatpush3.msra.mxu1 %v3443_v50 }
0x12db   :  { %2934 = vadd.xlane.f32.xlu0 %v2933_v48  ;;  %3888 = vmatprep.subr.mxu1 %v3442_v51  ;;  %v3457_v48 = vld [vmem:[%s4641_s6 + $0x3a] ss:$0 sm:$0xff] }
0x12dc   :  { %3889 = vmatpush3.msra.mxu1 %v3442_v51 }
0x12dd   :  { %2937 = vadd.xlane.f32.xlu1 %v2936_v49  ;;  %3912 = vmatprep.subr.mxu1 %v3991_v54 }
0x1360   :  { %v2928_v52 = vpop.xlane.xlu0 %2927 }
0x1361   :  { %v2930_v55 = vmul.f32 0.03125, %v2928_v52 }
0x1362   :  { %v2925_v53 = vpop.xlane.xlu1 %2924 }
0x1363   :  { %v2929_v56 = vmul.f32 0.03125, %v2925_v53  ;;  %v2942_v61 = vmul.f32 %v2930_v55, %v2930_v55  ;;  %v2946_v9 = vsub.f32 %v2920_v37, %v2930_v55 }
0x1364   :  { %v2935_v57 = vpop.xlane.xlu0 %2934 }
0x1365   :  { %v2941_v58 = vmul.f32 %v2929_v56, %v2929_v56  ;;  %v2939_v59 = vmul.f32 0.03125, %v2935_v57  ;;  %v2945_v3 = vsub.f32 %v2919_v40, %v2929_v56 }
0x1366   :  { %v2938_v60 = vpop.xlane.xlu1 %2937 }
0x1367   :  { %v2943_v42 = vsub.f32 %v2939_v59, %v2941_v58  ;;  %v2940_v38 = vmul.f32 0.03125, %v2938_v60  ;;  %v3218_v60 = vld [vmem:[%s4641_s6 + $0x1b] sm:$0xff] }
0x1369   :  { %v2947_v62 = vadd.f32 1e-12, %v2943_v42  ;;  %v2944_v63 = vsub.f32 %v2940_v38, %v2942_v61  ;;  %v3217_v61 = vld [vmem:[%s4641_s6 + $0x13] sm:$0xff]  ;;  %v3216_v42 = vld [vmem:[%s4641_s6 + $0xb] sm:$0xff]  ;;  %v3215_v38 = vld [vmem:[%s4641_s6 + $0x3] sm:$0xff] }
0x136b   :  { %3975 = vrsqrt.f32 %v2947_v62  ;;  %v2948_v0 = vadd.f32 1e-12, %v2944_v63 }
0x136d   :  { %3977 = vrsqrt.f32 %v2948_v0 }
0x1378   :  { %v3976_v2 = vpop.eup %3975 }
0x1379   :  { %v2955_v4 = vmul.f32 %v3976_v2, %v3440_v1 }
0x137a   :  { %v3978_v5 = vpop.eup %3977 }
0x137b   :  { %v2956_v7 = vmul.f32 %v3978_v5, %v3440_v1  ;;  %v2957_v11 = vmul.f32 %v2955_v4, %v2945_v3 }
0x137d   :  { %v2958_v12 = vmul.f32 %v2956_v7, %v2946_v9  ;;  %v2963_v26 = vadd.f32 %v3441_v8, %v2957_v11 }
0x137f   :  { %v2964_v13 = vadd.f32 %v3441_v8, %v2958_v12  ;;  %3890 = vmatprep.mubr.msk.f32.mxu1 %vm30_vm0, %v2963_v26 }
0x1381   :  { %3891 = vmatmul.mubr.msk.f32.vlgmr.msra.gmra.mxu1 %vm30_vm0, %v2964_v13 }
0x1382   :  { %3920 = vmatprep.mubr.msk.f32.mxu1 %vm3992_vm1, %v3991_v54  ;;  %3913 = vmatpush3.msra.mxu1 %v3218_v60 }
0x1383   :  { %3914 = vmatprep.subr.mxu1 %v3991_v54 }
0x1384   :  { %3915 = vmatpush3.msra.mxu1 %v3217_v61 }
0x1385   :  { %3916 = vmatprep.subr.mxu1 %v3991_v54 }
0x1386   :  { %3917 = vmatpush3.msra.mxu1 %v3216_v42 }
0x1387   :  { %3918 = vmatprep.subr.mxu1 %v3991_v54  ;;  %v3460_v54 = vld [vmem:[%s4641_s6 + $0x3b] ss:$0 sm:$0xff] }
0x1388   :  { %3919 = vmatpush3.msra.mxu1 %v3215_v38 }
0x1441   :  { %v3892_v20 = vpop.f32.mrf.mxu1 }
0x1442   :  { %v3053_v21 = vadd.f32 %v3892_v20, %v3446_v19 }
0x1443   :  { %v3047_v22 = vpop.f32.mrf.mxu1 }
0x1444   :  { %v3057_v23 = vmul.f32 %v3053_v21, %v3053_v21  ;;  %v3048_v24 = vadd.f32 %v3446_v19, %v3047_v22 }
0x1446   :  { %v3059_v25 = vmul.f32 %v3057_v23, %v3053_v21  ;;  %v3056_v27 = vmul.f32 %v3048_v24, %v3048_v24  ;;  %v3462_v23 = vld [vmem:[%s4641_s6 + $0x2] ss:$0 sm:$0xff] }
0x1448   :  { %v3061_v28 = vmul.f32 0.044715, %v3059_v25  ;;  %v3058_v29 = vmul.f32 %v3056_v27, %v3048_v24 }
0x144a   :  { %v3063_v31 = vadd.f32 %v3061_v28, %v3053_v21  ;;  %v3060_v32 = vmul.f32 0.044715, %v3058_v29 }
0x144c   :  { %v3065_v33 = vmul.f32 0.7978846, %v3063_v31  ;;  %v3062_v34 = vadd.f32 %v3060_v32, %v3048_v24 }
0x144e   :  { %3979 = vtanh.f32 %v3065_v33  ;;  %v3064_v35 = vmul.f32 0.7978846, %v3062_v34 }
0x1450   :  { %3981 = vtanh.f32 %v3064_v35 }
0x145b   :  { %v3980_v36 = vpop.eup %3979 }
0x145c   :  { %v3069_v37 = vadd.f32 1.0, %v3980_v36 }
0x145d   :  { %v3982_v39 = vpop.eup %3981 }
0x145e   :  { %v3068_v40 = vadd.f32 1.0, %v3982_v39  ;;  %v3071_v41 = vmul.f32 0.5, %v3069_v37 }
0x1460   :  { %v3070_v44 = vmul.f32 0.5, %v3068_v40  ;;  %v3073_v45 = vmul.f32 %v3071_v41, %v3053_v21 }
0x1462   :  { %v3072_v43 = vmul.f32 %v3070_v44, %v3048_v24 }
0x1464   :  { %3909 = vmatprep.mubr.msk.f32.mxu0 %vm1534_vm4, %v3072_v43 }
0x1465   :  { %3910 = vmatmul.mubr.msk.f32.vlgmr.msra.gmra.mxu0 %vm1534_vm4, %v3073_v45 }
0x1525   :  { %v3911_v49 = vpop.f32.mrf.mxu0 }
0x1526   :  { %v3166_v47 = vadd.f32 %v3911_v49, %v3457_v48 }
0x1527   :  { %v3160_v46 = vpop.f32.mrf.mxu0 }
0x1528   :  { %v3170_v50 = vadd.f32 %v3166_v47, %v2964_v13  ;;  %v3161_v51 = vadd.f32 %v3457_v48, %v3160_v46 }
0x152a   :  { %v3169_v52 = vadd.f32 %v3161_v51, %v2963_v26  ;;  %v3176_v53 = vsel %vm30_vm0, %v3170_v50, 0.0  ;;  %v3182_v55 = vmul.f32 %v3170_v50, %v3170_v50 }
0x152b   :  { %3177 = vadd.xlane.f32.xlu0 %v3176_v53 }
0x152c   :  { %v3173_v56 = vsel %vm30_vm0, %v3169_v52, 0.0  ;;  %v3181_v57 = vmul.f32 %v3169_v52, %v3169_v52  ;;  %v3186_v58 = vsel %vm30_vm0, %v3182_v55, 0.0 }
0x152d   :  { %3174 = vadd.xlane.f32.xlu1 %v3173_v56 }
0x152e   :  { %v3183_v59 = vsel %vm30_vm0, %v3181_v57, 0.0 }
0x152f   :  { %3187 = vadd.xlane.f32.xlu0 %v3186_v58 }
0x1531   :  { %3184 = vadd.xlane.f32.xlu1 %v3183_v59 }
0x15b4   :  { %v3178_v62 = vpop.xlane.xlu0 %3177 }
0x15b5   :  { %v3180_v63 = vmul.f32 0.03125, %v3178_v62 }
0x15b6   :  { %v3175_v0 = vpop.xlane.xlu1 %3174 }
0x15b7   :  { %v3179_v1 = vmul.f32 0.03125, %v3175_v0  ;;  %v3192_v3 = vmul.f32 %v3180_v63, %v3180_v63  ;;  %v3196_v14 = vsub.f32 %v3170_v50, %v3180_v63 }
0x15b8   :  { %v3188_v2 = vpop.xlane.xlu0 %3187 }
0x15b9   :  { %v3190_v4 = vmul.f32 0.03125, %v3188_v2  ;;  %v3191_v8 = vmul.f32 %v3179_v1, %v3179_v1  ;;  %v3195_v16 = vsub.f32 %v3169_v52, %v3179_v1 }
0x15ba   :  { %v3185_v5 = vpop.xlane.xlu1 %3184 }
0x15bb   :  { %v3194_v9 = vsub.f32 %v3190_v4, %v3192_v3  ;;  %v3189_v7 = vmul.f32 0.03125, %v3185_v5 }
0x15bd   :  { %v3198_v11 = vadd.f32 1e-12, %v3194_v9  ;;  %v3193_v12 = vsub.f32 %v3189_v7, %v3191_v8 }
0x15bf   :  { %3983 = vrsqrt.f32 %v3198_v11  ;;  %v3197_v26 = vadd.f32 1e-12, %v3193_v12 }
0x15c1   :  { %3985 = vrsqrt.f32 %v3197_v26 }
0x15cc   :  { %v3984_v13 = vpop.eup %3983 }
0x15cd   :  { %v3206_v15 = vmul.f32 %v3984_v13, %v3460_v54 }
0x15ce   :  { %v3986_v30 = vpop.eup %3985 }
0x15cf   :  { %v3205_v17 = vmul.f32 %v3986_v30, %v3460_v54  ;;  %v3208_v18 = vmul.f32 %v3206_v15, %v3196_v14 }
0x15d1   :  { %v3207_v10 = vmul.f32 %v3205_v17, %v3195_v16  ;;  %v3214_v19 = vadd.f32 %v3461_v6, %v3208_v18 }
0x15d3   :  { %v3213_v20 = vadd.f32 %v3461_v6, %v3207_v10  ;;  %v3226_v21 = vrot.slane %v3214_v19, 7 }
0x15d5   :  { %v3228_v22 = vsel %vm3227_vm5, %v3226_v21, %v3213_v20 }
0x15d6   :  { %3921 = vmatmul.mubr.msk.f32.vlgmr.msra.gmra.mxu1 %vm30_vm0, %v3228_v22 }
0x1696   :  { %v3297_v24 = vpop.f32.mrf.mxu1 }
0x1697   :  { %v3298_v25 = vadd.f32 %v3462_v23, %v3297_v24 }
0x1698   :  { %v3922_v27 = vpop.f32.mrf.mxu1 }
0x1699   :  { %v3301_v28 = vmax.f32 %v3298_v25, 0.0 }
0x169b   :  { %v3464_v29 = vmul.f32 -1.442695, %v3301_v28 }
0x169d   :  { %3987 = vpow2.f32 %v3464_v29 }
0x16aa   :  { %v3988_v31 = vpop.eup %3987 }
0x16ab   :  { %v3305_v32 = vadd.f32 1.0, %v3988_v31 }
0x16ad   :  { %3989 = vrcp.f32 %v3305_v32 }
0x16ba   :  { %v3990_v33 = vpop.eup %3989 }
0x16bb   :  { %3308 = vst [vmem:[%s4646_s7] sm:$0x3] %v3990_v33 }

</bundles_post_ra>
